<compile_context>
chip_gen: v5e
topology: v5e:2x2
jax: 0.10.0
libtpu: 0.0.40
codegen_flags: <defaults>
</compile_context>

<pallas_src>
import functools
import math

import jax
import jax.numpy as jnp
from jax.experimental import pallas as pl
from jax.experimental.pallas import tpu as pltpu

BN_EPS = 1e-5


def _pick_tm(M):
    """Row tile: >=2 parallel grid steps when possible (feeds both v7x TCs)."""
    for tm in (256, 128, 64, 32, 16, 8):
        if M % tm == 0 and M // tm >= 2:
            return tm
    return M


# -----------------------------------------------------------------------------
# Pallas kernels
# -----------------------------------------------------------------------------
def _matmul_prelu_kernel(x_ref, w_ref, a_ref, o_ref):
    # conv1 as im2col matmul (bf16 MXU, f32 accumulate) + fused per-channel PReLU.
    acc = jnp.dot(x_ref[...], w_ref[...], preferred_element_type=jnp.float32)
    a = a_ref[...].astype(jnp.float32)                       # (1, N) broadcast
    o_ref[...] = jnp.where(acc >= 0.0, acc, acc * a).astype(o_ref.dtype)


def _dual_matmul_bias_kernel(p_ref, w_ref, xs_ref, wsc_ref, b_ref, o_ref):
    # conv2 (BN2 folded) + 1x1-conv shortcut (BN folded) + combined bias, fused.
    acc = jnp.dot(p_ref[...], w_ref[...], preferred_element_type=jnp.float32)
    acc = acc + jnp.dot(xs_ref[...], wsc_ref[...], preferred_element_type=jnp.float32)
    o_ref[...] = (acc + b_ref[...].astype(jnp.float32)).astype(o_ref.dtype)


def _matmul_add_bias_kernel(p_ref, w_ref, xs_ref, b_ref, o_ref):
    # conv2 (BN2 folded) + identity (MaxPool2d(1, stride)) shortcut + bias, fused.
    acc = jnp.dot(p_ref[...], w_ref[...], preferred_element_type=jnp.float32)
    acc = acc + xs_ref[...].astype(jnp.float32)              # keep skip path f32
    o_ref[...] = (acc + b_ref[...].astype(jnp.float32)).astype(o_ref.dtype)


# -----------------------------------------------------------------------------
# Kernel wrappers
# -----------------------------------------------------------------------------
def conv1_prelu(patches, w_mat, prelu_a):
    M, K = patches.shape
    N = w_mat.shape[1]
    tm = _pick_tm(M)
    return pl.pallas_call(
        _matmul_prelu_kernel,
        out_shape=jax.ShapeDtypeStruct((M, N), jnp.bfloat16),
        grid=(M // tm,),
        in_specs=[
            pl.BlockSpec((tm, K), lambda i: (i, 0)),
            pl.BlockSpec((K, N), lambda i: (0, 0)),
            pl.BlockSpec((1, N), lambda i: (0, 0)),
        ],
        out_specs=pl.BlockSpec((tm, N), lambda i: (i, 0)),
        compiler_params=pltpu.CompilerParams(dimension_semantics=("parallel",)),
    )(patches.astype(jnp.bfloat16), w_mat.astype(jnp.bfloat16),
      prelu_a.reshape(1, N).astype(jnp.float32))


def conv2_plus_conv_shortcut(patches2, w2_mat, xs, wsc_mat, bias):
    M, K = patches2.shape
    N = w2_mat.shape[1]
    Ksc = xs.shape[1]
    tm = _pick_tm(M)
    return pl.pallas_call(
        _dual_matmul_bias_kernel,
        out_shape=jax.ShapeDtypeStruct((M, N), jnp.float32),
        grid=(M // tm,),
        in_specs=[
            pl.BlockSpec((tm, K), lambda i: (i, 0)),
            pl.BlockSpec((K, N), lambda i: (0, 0)),
            pl.BlockSpec((tm, Ksc), lambda i: (i, 0)),
            pl.BlockSpec((Ksc, N), lambda i: (0, 0)),
            pl.BlockSpec((1, N), lambda i: (0, 0)),
        ],
        out_specs=pl.BlockSpec((tm, N), lambda i: (i, 0)),
        compiler_params=pltpu.CompilerParams(dimension_semantics=("parallel",)),
    )(patches2.astype(jnp.bfloat16), w2_mat.astype(jnp.bfloat16),
      xs.astype(jnp.bfloat16), wsc_mat.astype(jnp.bfloat16),
      bias.reshape(1, N).astype(jnp.float32))


def conv2_plus_identity_shortcut(patches2, w2_mat, xs, bias):
    M, K = patches2.shape
    N = w2_mat.shape[1]
    tm = _pick_tm(M)
    return pl.pallas_call(
        _matmul_add_bias_kernel,
        out_shape=jax.ShapeDtypeStruct((M, N), jnp.float32),
        grid=(M // tm,),
        in_specs=[
            pl.BlockSpec((tm, K), lambda i: (i, 0)),
            pl.BlockSpec((K, N), lambda i: (0, 0)),
            pl.BlockSpec((tm, N), lambda i: (i, 0)),
            pl.BlockSpec((1, N), lambda i: (0, 0)),
        ],
        out_specs=pl.BlockSpec((tm, N), lambda i: (i, 0)),
        compiler_params=pltpu.CompilerParams(dimension_semantics=("parallel",)),
    )(patches2.astype(jnp.bfloat16), w2_mat.astype(jnp.bfloat16),
      xs.astype(jnp.float32), bias.reshape(1, N).astype(jnp.float32))


# -----------------------------------------------------------------------------
# Plain-JAX glue (layout / im2col only — no hot compute here)
# -----------------------------------------------------------------------------
def _im2col_3x3(x_nhwc, stride):
    """3x3 / pad-1 / given-stride patch extraction. NHWC -> (B*Ho*Wo, 9*C), tap-major."""
    B, H, W, C = x_nhwc.shape
    xp = jnp.pad(x_nhwc, ((0, 0), (1, 1), (1, 1), (0, 0)))
    Ho = (H - 1) // stride + 1
    Wo = (W - 1) // stride + 1
    taps = []
    for dh in range(3):
        for dw in range(3):
            taps.append(xp[:, dh:dh + stride * (Ho - 1) + 1:stride,
                           dw:dw + stride * (Wo - 1) + 1:stride, :])
    patches = jnp.concatenate(taps, axis=-1)                 # (B, Ho, Wo, 9*C)
    return patches.reshape(B * Ho * Wo, 9 * C), (Ho, Wo)


def _conv3x3_weight_matrix(w):
    """(Cout, Cin, 3, 3) -> (9*Cin, Cout) matching tap-major / channel-minor patches."""
    Cout, Cin = w.shape[0], w.shape[1]
    return jnp.transpose(w, (2, 3, 1, 0)).reshape(9 * Cin, Cout)


# -----------------------------------------------------------------------------
# `bottleneck_IR` forward
# -----------------------------------------------------------------------------
def bottleneck_ir_forward(params, x_nchw, *, stride):
    B, Cin, H, W = x_nchw.shape
    depth = params["w1_mat"].shape[1]
    x = jnp.transpose(x_nchw, (0, 2, 3, 1)).astype(jnp.float32)      # NHWC

    # ---- residual branch ----
    # BN1 (eval) as per-channel affine, applied before zero padding (exact).
    x_bn = x * params["bn1_s"] + params["bn1_t"]
    p1, _ = _im2col_3x3(x_bn, stride=1)
    mid = conv1_prelu(p1, params["w1_mat"], params["prelu_a"])       # bf16, (B*H*W, depth)
    mid = mid.reshape(B, H, W, depth)
    p2, (Ho, Wo) = _im2col_3x3(mid, stride=stride)

    # ---- shortcut operand: strided input samples (NHWC) ----
    xs = x[:, ::stride, ::stride, :].reshape(B * Ho * Wo, Cin)

    if "wsc_mat" in params:      # in_channel != depth: 1x1 conv (stride) + BN, folded
        out = conv2_plus_conv_shortcut(p2, params["w2_mat"], xs,
                                       params["wsc_mat"], params["bias"])
    else:                        # in_channel == depth: MaxPool2d(1, stride) == strided identity
        out = conv2_plus_identity_shortcut(p2, params["w2_mat"], xs, params["bias"])

    out = out.reshape(B, Ho, Wo, depth)
    return jnp.transpose(out, (0, 3, 1, 2))                          # back to NCHW


# -----------------------------------------------------------------------------
# Deterministic parameter construction (eval-mode BN stats folded)
# -----------------------------------------------------------------------------
def make_params(key, in_channel, depth):
    ks = jax.random.split(key, 12)

    def normal(k, shape, fan_in):
        return jax.random.normal(k, shape, jnp.float32) / math.sqrt(fan_in)

    def bn_affine(kg, kb, km, kv, c):
        gamma = 1.0 + 0.1 * jax.random.normal(kg, (c,), jnp.float32)
        beta = 0.1 * jax.random.normal(kb, (c,), jnp.float32)
        mean = 0.1 * jax.random.normal(km, (c,), jnp.float32)
        var = jnp.abs(jax.random.normal(kv, (c,), jnp.float32)) + 0.5
        s = gamma / jnp.sqrt(var + BN_EPS)
        t = beta - mean * s
        return s, t

    w1 = normal(ks[0], (depth, in_channel, 3, 3), in_channel * 9)
    w2 = normal(ks[1], (depth, depth, 3, 3), depth * 9)
    s1, t1 = bn_affine(ks[2], ks[3], ks[4], ks[5], in_channel)
    s2, t2 = bn_affine(ks[6], ks[7], ks[8], ks[9], depth)

    params = {
        "bn1_s": s1, "bn1_t": t1,
        "w1_mat": _conv3x3_weight_matrix(w1),
        "prelu_a": jnp.full((depth,), 0.25, jnp.float32),            # PReLU default init
        "w2_mat": _conv3x3_weight_matrix(w2) * s2[None, :],          # BN2 folded
    }
    if in_channel != depth:
        wsc = normal(ks[10], (depth, in_channel, 1, 1), in_channel)
        ssc, tsc = bn_affine(*jax.random.split(ks[11], 4), depth)
        params["wsc_mat"] = wsc[:, :, 0, 0].T * ssc[None, :]         # shortcut BN folded
        params["bias"] = t2 + tsc
    else:
        params["bias"] = t2
    return params


# -----------------------------------------------------------------------------
if __name__ == "__main__":
    key = jax.random.PRNGKey(0)
    kpa, kpb, kxa, kxb = jax.random.split(key, 4)

    # Case A: channel-expanding block (conv + BN shortcut), stride 2.
    params_a = make_params(kpa, in_channel=64, depth=128)
    x_a = jax.random.normal(kxa, (2, 64, 16, 16), jnp.float32)
    fwd_a = jax.jit(functools.partial(bottleneck_ir_forward, stride=2))
    out_a = jax.block_until_ready(fwd_a(params_a, x_a))
    assert out_a.shape == (2, 128, 8, 8) and out_a.dtype == jnp.float32
    assert bool(jnp.all(jnp.isfinite(out_a)))

    # Case B: identity (MaxPool2d(1, stride)) shortcut, stride 1.
    params_b = make_params(kpb, in_channel=128, depth=128)
    x_b = jax.random.normal(kxb, (2, 128, 16, 16), jnp.float32)
    fwd_b = jax.jit(functools.partial(bottleneck_ir_forward, stride=1))
    out_b = jax.block_until_ready(fwd_b(params_b, x_b))
    assert out_b.shape == (2, 128, 16, 16) and out_b.dtype == jnp.float32
    assert bool(jnp.all(jnp.isfinite(out_b)))

    print("KERNEL_OK")
</pallas_src>

<mosaic_0001>
module attributes {stable_mosaic.version = 11 : i64} {
  func.func @_matmul_prelu_kernel(%arg0: i32, %arg1: memref<256x576xbf16, #tpu.memory_space<vmem>>, %arg2: memref<576x128xbf16, #tpu.memory_space<vmem>>, %arg3: memref<1x128xf32, #tpu.memory_space<vmem>>, %arg4: memref<256x128xbf16, #tpu.memory_space<vmem>>) attributes {dimension_semantics = [#tpu.dimension_semantics<parallel>], iteration_bounds = array<i64: 2>, scalar_prefetch = 0 : i64, scratch_operands = 0 : i64, tpu.core_type = #tpu.core_type<tc>, window_params = [{transform_indices = @transform_0, window_bounds = array<i64: 256, 576>}, {pipeline_mode = #tpu.pipeline_mode<synchronous>, transform_indices = @transform_1, window_bounds = array<i64: 576, 128>}, {pipeline_mode = #tpu.pipeline_mode<synchronous>, transform_indices = @transform_2, window_bounds = array<i64: 1, 128>}, {transform_indices = @transform_3, window_bounds = array<i64: 256, 128>}]} {
    %c0 = arith.constant 0 : index
    %c0_0 = arith.constant 0 : index
    %0 = vector.load %arg1[%c0, %c0_0] : memref<256x576xbf16, #tpu.memory_space<vmem>>, vector<256x576xbf16>
    %c0_1 = arith.constant 0 : index
    %c0_2 = arith.constant 0 : index
    %1 = vector.load %arg2[%c0_1, %c0_2] : memref<576x128xbf16, #tpu.memory_space<vmem>>, vector<576x128xbf16>
    %cst = arith.constant dense<0.000000e+00> : vector<256x128xf32>
    %2 = tpu.matmul %0, %1, %cst {dimension_numbers = #tpu.dot_dimension_numbers<[1], [0], [0], [1], [0, 0, 1, 1], [], []>} : vector<256x576xbf16>, vector<576x128xbf16>, vector<256x128xf32> -> vector<256x128xf32>
    %c0_3 = arith.constant 0 : index
    %c0_4 = arith.constant 0 : index
    %3 = vector.load %arg3[%c0_3, %c0_4] : memref<1x128xf32, #tpu.memory_space<vmem>>, vector<1x128xf32>
    %cst_5 = arith.constant 0.000000e+00 : f32
    %4 = vector.broadcast %cst_5 : f32 to vector<256x128xf32>
    %5 = arith.cmpf oge, %2, %4 : vector<256x128xf32>
    %6 = vector.broadcast %3 : vector<1x128xf32> to vector<256x128xf32>
    %7 = arith.mulf %2, %6 : vector<256x128xf32>
    %8 = arith.select %5, %2, %7 : vector<256x128xi1>, vector<256x128xf32>
    %9 = arith.truncf %8 : vector<256x128xf32> to vector<256x128xbf16>
    %c0_6 = arith.constant 0 : index
    %c0_7 = arith.constant 0 : index
    %10 = vector.load %arg4[%c0_6, %c0_7] : memref<256x128xbf16, #tpu.memory_space<vmem>>, vector<256x128xbf16>
    tpu.vector_store %arg4[%c0_6, %c0_7], %9 {strides = array<i32>} : memref<256x128xbf16, #tpu.memory_space<vmem>>, vector<256x128xbf16>,
    return
  }
  func.func @transform_0(%arg0: i32) -> (i32, i32) {
    %c0_i32 = arith.constant 0 : i32
    %c0_i32_0 = arith.constant 0 : i32
    return %arg0, %c0_i32 : i32, i32
  }
  func.func @transform_1(%arg0: i32) -> (i32, i32) {
    %c0_i32 = arith.constant 0 : i32
    %c0_i32_0 = arith.constant 0 : i32
    %c0_i32_1 = arith.constant 0 : i32
    return %c0_i32, %c0_i32_0 : i32, i32
  }
  func.func @transform_2(%arg0: i32) -> (i32, i32) {
    %c0_i32 = arith.constant 0 : i32
    %c0_i32_0 = arith.constant 0 : i32
    %c0_i32_1 = arith.constant 0 : i32
    return %c0_i32, %c0_i32_0 : i32, i32
  }
  func.func @transform_3(%arg0: i32) -> (i32, i32) {
    %c0_i32 = arith.constant 0 : i32
    %c0_i32_0 = arith.constant 0 : i32
    return %arg0, %c0_i32 : i32, i32
  }
}

module attributes {stable_mosaic.version = 11 : i64} {
  func.func @_dual_matmul_bias_kernel(%arg0: i32, %arg1: memref<64x1152xbf16, #tpu.memory_space<vmem>>, %arg2: memref<1152x128xbf16, #tpu.memory_space<vmem>>, %arg3: memref<64x64xbf16, #tpu.memory_space<vmem>>, %arg4: memref<64x128xbf16, #tpu.memory_space<vmem>>, %arg5: memref<1x128xf32, #tpu.memory_space<vmem>>, %arg6: memref<64x128xf32, #tpu.memory_space<vmem>>) attributes {dimension_semantics = [#tpu.dimension_semantics<parallel>], iteration_bounds = array<i64: 2>, scalar_prefetch = 0 : i64, scratch_operands = 0 : i64, tpu.core_type = #tpu.core_type<tc>, window_params = [{transform_indices = @transform_0, window_bounds = array<i64: 64, 1152>}, {pipeline_mode = #tpu.pipeline_mode<synchronous>, transform_indices = @transform_1, window_bounds = array<i64: 1152, 128>}, {transform_indices = @transform_2, window_bounds = array<i64: 64, 64>}, {pipeline_mode = #tpu.pipeline_mode<synchronous>, transform_indices = @transform_3, window_bounds = array<i64: 64, 128>}, {pipeline_mode = #tpu.pipeline_mode<synchronous>, transform_indices = @transform_4, window_bounds = array<i64: 1, 128>}, {transform_indices = @transform_5, window_bounds = array<i64: 64, 128>}]} {
    %c0 = arith.constant 0 : index
    %c0_0 = arith.constant 0 : index
    %0 = vector.load %arg1[%c0, %c0_0] : memref<64x1152xbf16, #tpu.memory_space<vmem>>, vector<64x1152xbf16>
    %c0_1 = arith.constant 0 : index
    %c0_2 = arith.constant 0 : index
    %1 = vector.load %arg2[%c0_1, %c0_2] : memref<1152x128xbf16, #tpu.memory_space<vmem>>, vector<1152x128xbf16>
    %cst = arith.constant dense<0.000000e+00> : vector<64x128xf32>
    %2 = tpu.matmul %0, %1, %cst {dimension_numbers = #tpu.dot_dimension_numbers<[1], [0], [0], [1], [0, 0, 1, 1], [], []>} : vector<64x1152xbf16>, vector<1152x128xbf16>, vector<64x128xf32> -> vector<64x128xf32>
    %c0_3 = arith.constant 0 : index
    %c0_4 = arith.constant 0 : index
    %3 = vector.load %arg3[%c0_3, %c0_4] : memref<64x64xbf16, #tpu.memory_space<vmem>>, vector<64x64xbf16>
    %c0_5 = arith.constant 0 : index
    %c0_6 = arith.constant 0 : index
    %4 = vector.load %arg4[%c0_5, %c0_6] : memref<64x128xbf16, #tpu.memory_space<vmem>>, vector<64x128xbf16>
    %cst_7 = arith.constant dense<0.000000e+00> : vector<64x128xf32>
    %5 = tpu.matmul %3, %4, %cst_7 {dimension_numbers = #tpu.dot_dimension_numbers<[1], [0], [0], [1], [0, 0, 1, 1], [], []>} : vector<64x64xbf16>, vector<64x128xbf16>, vector<64x128xf32> -> vector<64x128xf32>
    %6 = arith.addf %2, %5 : vector<64x128xf32>
    %c0_8 = arith.constant 0 : index
    %c0_9 = arith.constant 0 : index
    %7 = vector.load %arg5[%c0_8, %c0_9] : memref<1x128xf32, #tpu.memory_space<vmem>>, vector<1x128xf32>
    %8 = vector.broadcast %7 : vector<1x128xf32> to vector<64x128xf32>
    %9 = arith.addf %6, %8 : vector<64x128xf32>
    %c0_10 = arith.constant 0 : index
    %c0_11 = arith.constant 0 : index
    %10 = vector.load %arg6[%c0_10, %c0_11] : memref<64x128xf32, #tpu.memory_space<vmem>>, vector<64x128xf32>
    tpu.vector_store %arg6[%c0_10, %c0_11], %9 {strides = array<i32>} : memref<64x128xf32, #tpu.memory_space<vmem>>, vector<64x128xf32>,
    return
  }
  func.func @transform_0(%arg0: i32) -> (i32, i32) {
    %c0_i32 = arith.constant 0 : i32
    %c0_i32_0 = arith.constant 0 : i32
    return %arg0, %c0_i32 : i32, i32
  }
  func.func @transform_1(%arg0: i32) -> (i32, i32) {
    %c0_i32 = arith.constant 0 : i32
    %c0_i32_0 = arith.constant 0 : i32
    %c0_i32_1 = arith.constant 0 : i32
    return %c0_i32, %c0_i32_0 : i32, i32
  }
  func.func @transform_2(%arg0: i32) -> (i32, i32) {
    %c0_i32 = arith.constant 0 : i32
    %c0_i32_0 = arith.constant 0 : i32
    return %arg0, %c0_i32 : i32, i32
  }
  func.func @transform_3(%arg0: i32) -> (i32, i32) {
    %c0_i32 = arith.constant 0 : i32
    %c0_i32_0 = arith.constant 0 : i32
    %c0_i32_1 = arith.constant 0 : i32
    return %c0_i32, %c0_i32_0 : i32, i32
  }
  func.func @transform_4(%arg0: i32) -> (i32, i32) {
    %c0_i32 = arith.constant 0 : i32
    %c0_i32_0 = arith.constant 0 : i32
    %c0_i32_1 = arith.constant 0 : i32
    return %c0_i32, %c0_i32_0 : i32, i32
  }
  func.func @transform_5(%arg0: i32) -> (i32, i32) {
    %c0_i32 = arith.constant 0 : i32
    %c0_i32_0 = arith.constant 0 : i32
    return %arg0, %c0_i32 : i32, i32
  }
}

</mosaic_0001>

<bundles_post_ra>
// kernel: bottleneck_ir_forward.2
= control target key start
LH: loop header
LB: loop body
LE: loop exit
PB: predicated region body
PF: predicated region fallthrough
CT: control target
= control target key end

     0   :  { %s2440_s12 = smov 0   ;;  %s2898_s0 = inlined_call_operand.vmem [shape: bf16[512,576], index: 0, kind: input, shape index: {}]   ;;  %s2899_s1 = inlined_call_operand.vmem [shape: bf16[576,128], index: 1, kind: input, shape index: {}]   ;;  %s2900_s2 = inlined_call_operand.vmem [shape: f32[1,128], index: 2, kind: input, shape index: {}]   ;;  %s2901_s3 = inlined_call_operand.vmem [shape: bf16[512,128], index: 3, kind: output, shape index: {}]  }
   0x1 LB: > { %s1676_s13 = sadd.s32 4294967295, %s2418_s12   ;;  %p1680_p0 = scmp.ge.s32.totalorder %s2418_s12, 1  ;;  %s2418_s12 = sphi %s2440_s12, %s13_s12  }
   0x2   : > { %p139_p1 = scmp.lt.s32.totalorder %s2418_s12, 3 }
   0x4   : > { %p140_p2 = pnand %p1680_p0, %p139_p1 }
   0x5   : > { %s1681_s20 = sshll.u32 (!%p140_p2), %s1676_s13, 5 }
   0x6   : > { %143 = sbr.rel (%p140_p2) target bundleno = 499 (0x1f3), region = 32  ;;  %p165_p3 = scmp.lt.s32.totalorder (!%p140_p2), %s1681_s20, 63 }
   0xb   : > { %v2254_v0 = vld [vmem:[%s2899_s1 + $0x38] sm:$0xff]  ;;  %v2253_v1 = vld [vmem:[%s2899_s1 + $0x30] sm:$0xff]  ;;  %v2252_v2 = vld [vmem:[%s2899_s1 + $0x28] sm:$0xff]  ;;  %s2903_s20 = smov (!%p165_p3, %s1681_s20), 63  ;;  %vm962_vm0 = vcmask 523264  }
   0xc   : > { %2378 = vmatpush.bf16.msra.mxu1 %v2254_v0  ;;  %2379 = vmatpush.bf16.msra.mxu2 %v2254_v0  ;;  %v2251_v3 = vld [vmem:[%s2899_s1 + $0x20] sm:$0xff]  ;;  %v2250_v4 = vld [vmem:[%s2899_s1 + $0x18] sm:$0xff]  ;;  %v2249_v5 = vld [vmem:[%s2899_s1 + $0x10] sm:$0xff]  ;;  %s2402_s27 = smul.u32 20, %s2903_s20  ;;  %s1684_s19 = sshll.u32 %s2903_s20, 2 }
   0xd   : > { %2380 = vmatpush.bf16.msra.mxu3 %v2254_v0  ;;  %1011 = vmatpush.bf16.msra.mxu0 %v2254_v0  ;;  %v2248_v6 = vld [vmem:[%s2899_s1 + $0x8] sm:$0xff]  ;;  %v2247_v7 = vld [vmem:[%s2899_s1] sm:$0xff]  ;;  %v2270_v16 = vld [vmem:[%s2899_s1 + $0xb8] sm:$0xff]  ;;  %s2764_s20 = scalar_lea.vmem %s2901_s3, %s1684_s19 }
   0xe   : > { %s2475_s5 = scalar_lea.vmem %s2898_s0, %s2402_s27  ;;  %v2278_v17 = vld [vmem:[%s2899_s1 + $0xf8] sm:$0xff]  ;;  %v2269_v24 = vld [vmem:[%s2899_s1 + $0xb0] sm:$0xff]  ;;  %v2268_v28 = vld [vmem:[%s2899_s1 + $0xa8] sm:$0xff] }
   0xf   : > { %v1767_v8 = vld [vmem:[%s2475_s5 + $0xa0] sm:$0xf]  ;;  %v2189_v9 = vld [vmem:[%s2475_s5 + $0xb0] sm:$0xf0]  ;;  %v2262_v22 = vld [vmem:[%s2899_s1 + $0x78] sm:$0xff] }
  0x10   : > { %2381 = vmatpush.bf16.msra.mxu1 %v2253_v1  ;;  %2382 = vmatpush.bf16.msra.mxu2 %v2253_v1  ;;  %v1847_v10 = vld [vmem:[%s2475_s5 + $0x140] sm:$0xf]  ;;  %v2209_v11 = vld [vmem:[%s2475_s5 + $0x150] sm:$0xf0]  ;;  %v1768_v18 = vor.u32 %v2189_v9, %v1767_v8  ;;  %v2282_v23 = vld [vmem:[%s2899_s1 + $0x118] sm:$0xff] }
  0x11   : > { %2383 = vmatpush.bf16.msra.mxu3 %v2253_v1  ;;  %1012 = vmatpush.bf16.msra.mxu0 %v2253_v1  ;;  %v1927_v12 = vld [vmem:[%s2475_s5 + $0x1e0] sm:$0xf]  ;;  %v2229_v13 = vld [vmem:[%s2475_s5 + $0x1f0] sm:$0xf0]  ;;  %v1848_v19 = vor.u32 %v2209_v11, %v1847_v10  ;;  %v2276_v29 = vld [vmem:[%s2899_s1 + $0xe8] sm:$0xff] }
  0x12   : > { %v1687_v14 = vld [vmem:[%s2475_s5] sm:$0xf]  ;;  %v2169_v15 = vld [vmem:[%s2475_s5 + $0x10] sm:$0xf0]  ;;  %v1928_v20 = vor.u32 %v2229_v13, %v1927_v12  ;;  %v2260_v30 = vld [vmem:[%s2899_s1 + $0x68] sm:$0xff] }
  0x13   : > { %v1688_v21 = vor.u32 %v2169_v15, %v1687_v14  ;;  %v2277_v25 = vld [vmem:[%s2899_s1 + $0xf0] sm:$0xff]  ;;  %v2280_v31 = vld [vmem:[%s2899_s1 + $0x108] sm:$0xff]  ;;  %v2267_v32 = vld [vmem:[%s2899_s1 + $0xa0] sm:$0xff] }
  0x14   : > { %2384 = vmatpush.bf16.msra.mxu1 %v2252_v2  ;;  %2385 = vmatpush.bf16.msra.mxu2 %v2252_v2  ;;  %v2261_v26 = vld [vmem:[%s2899_s1 + $0x70] sm:$0xff]  ;;  %v2275_v33 = vld [vmem:[%s2899_s1 + $0xe0] sm:$0xff]  ;;  %v1787_v34 = vld [vmem:[%s2475_s5 + $0xc8] sm:$0xf] }
  0x15   : > { %2386 = vmatpush.bf16.msra.mxu3 %v2252_v2  ;;  %1013 = vmatpush.bf16.msra.mxu0 %v2252_v2  ;;  %v2281_v27 = vld [vmem:[%s2899_s1 + $0x110] sm:$0xff]  ;;  %v2194_v35 = vld [vmem:[%s2475_s5 + $0xd8] sm:$0xf0]  ;;  %v1867_v36 = vld [vmem:[%s2475_s5 + $0x168] sm:$0xf] }
  0x16   : > { %v2214_v37 = vld [vmem:[%s2475_s5 + $0x178] sm:$0xf0]  ;;  %v1947_v38 = vld [vmem:[%s2475_s5 + $0x208] sm:$0xf]  ;;  %v2259_v42 = vld [vmem:[%s2899_s1 + $0x60] sm:$0xff]  ;;  %v1788_v45 = vor.u32 %v2194_v35, %v1787_v34 }
  0x17   : > { %v2234_v39 = vld [vmem:[%s2475_s5 + $0x218] sm:$0xf0]  ;;  %v1707_v40 = vld [vmem:[%s2475_s5 + $0x28] sm:$0xf]  ;;  %v1868_v46 = vor.u32 %v2214_v37, %v1867_v36  ;;  %v2265_v50 = vld [vmem:[%s2899_s1 + $0x90] sm:$0xff] }
  0x18   : > { %2387 = vmatpush.bf16.msra.mxu1 %v2251_v3  ;;  %2388 = vmatpush.bf16.msra.mxu2 %v2251_v3  ;;  %v2174_v41 = vld [vmem:[%s2475_s5 + $0x38] sm:$0xf0]  ;;  %v1948_v47 = vor.u32 %v2234_v39, %v1947_v38  ;;  %v2273_v51 = vld [vmem:[%s2899_s1 + $0xd0] sm:$0xff]  ;;  %v2279_v53 = vld [vmem:[%s2899_s1 + $0x100] sm:$0xff] }
  0x19   : > { %2389 = vmatpush.bf16.msra.mxu3 %v2251_v3  ;;  %1014 = vmatpush.bf16.msra.mxu0 %v2251_v3  ;;  %v2266_v43 = vld [vmem:[%s2899_s1 + $0x98] sm:$0xff]  ;;  %v1708_v48 = vor.u32 %v2174_v41, %v1707_v40  ;;  %v2257_v52 = vld [vmem:[%s2899_s1 + $0x50] sm:$0xff]  ;;  %v2264_v54 = vld [vmem:[%s2899_s1 + $0x88] sm:$0xff] }
  0x1a   : > { %v2274_v44 = vld [vmem:[%s2899_s1 + $0xd8] sm:$0xff]  ;;  %v2272_v55 = vld [vmem:[%s2899_s1 + $0xc8] sm:$0xff]  ;;  %v2263_v57 = vld [vmem:[%s2899_s1 + $0x80] sm:$0xff] }
  0x1b   : > { %v2258_v49 = vld [vmem:[%s2899_s1 + $0x58] sm:$0xff]  ;;  %v2256_v56 = vld [vmem:[%s2899_s1 + $0x48] sm:$0xff]  ;;  %v2271_v58 = vld [vmem:[%s2899_s1 + $0xc0] sm:$0xff] }
  0x1c   : > { %2390 = vmatpush.bf16.msra.mxu1 %v2250_v4  ;;  %2391 = vmatpush.bf16.msra.mxu2 %v2250_v4  ;;  %v1807_v59 = vld [vmem:[%s2475_s5 + $0xf0] sm:$0xf]  ;;  %v2199_v60 = vld [vmem:[%s2475_s5 + $0x100] sm:$0xf0]  ;;  %v1827_v8 = vld [vmem:[%s2475_s5 + $0x118] sm:$0xf] }
  0x1d   : > { %2392 = vmatpush.bf16.msra.mxu3 %v2250_v4  ;;  %1015 = vmatpush.bf16.msra.mxu0 %v2250_v4  ;;  %v1887_v61 = vld [vmem:[%s2475_s5 + $0x190] sm:$0xf]  ;;  %v2219_v62 = vld [vmem:[%s2475_s5 + $0x1a0] sm:$0xf0]  ;;  %v1808_v4 = vor.u32 %v2199_v60, %v1807_v59  ;;  %v2204_v9 = vld [vmem:[%s2475_s5 + $0x128] sm:$0xf0] }
  0x1e   : > { %v1967_v63 = vld [vmem:[%s2475_s5 + $0x230] sm:$0xf]  ;;  %v2239_v0 = vld [vmem:[%s2475_s5 + $0x240] sm:$0xf0]  ;;  %v1907_v10 = vld [vmem:[%s2475_s5 + $0x1b8] sm:$0xf] }
  0x1f   : > { %v1727_v1 = vld [vmem:[%s2475_s5 + $0x50] sm:$0xf]  ;;  %v2179_v2 = vld [vmem:[%s2475_s5 + $0x60] sm:$0xf0]  ;;  %v2224_v11 = vld [vmem:[%s2475_s5 + $0x1c8] sm:$0xf0] }
  0x20   : > { %2393 = vmatpush.bf16.msra.mxu1 %v2249_v5  ;;  %2394 = vmatpush.bf16.msra.mxu2 %v2249_v5  ;;  %v2255_v3 = vld [vmem:[%s2899_s1 + $0x40] sm:$0xff]  ;;  %v1987_v12 = vld [vmem:[%s2475_s5 + $0x258] sm:$0xf]  ;;  %v2244_v13 = vld [vmem:[%s2475_s5 + $0x268] sm:$0xf0] }
  0x21   : > { %2395 = vmatpush.bf16.msra.mxu3 %v2249_v5  ;;  %1016 = vmatpush.bf16.msra.mxu0 %v2249_v5  ;;  %v1888_v5 = vor.u32 %v2219_v62, %v1887_v61  ;;  %v1747_v14 = vld [vmem:[%s2475_s5 + $0x78] sm:$0xf]  ;;  %v2184_v15 = vld [vmem:[%s2475_s5 + $0x88] sm:$0xf0]  ;;  %v1715_v34 = vld [vmem:[%s2475_s5 + $0x30] sm:$0xf] }
  0x22   : > { %v2175_v35 = vld [vmem:[%s2475_s5 + $0x40] sm:$0xf0]  ;;  %v2173_v36 = vld [vmem:[%s2475_s5 + $0x34] sm:$0xf]  ;;  %v1717_v37 = vld [vmem:[%s2475_s5 + $0x44] sm:$0xf0] }
  0x23   : > { %v1723_v38 = vld [vmem:[%s2475_s5 + $0x38] sm:$0xf]  ;;  %v2176_v39 = vld [vmem:[%s2475_s5 + $0x48] sm:$0xf0]  ;;  %v1716_v41 = vor.u32 %v2175_v35, %v1715_v34  ;;  %v2185_v59 = vld [vmem:[%s2475_s5 + $0x90] sm:$0xf0] }
  0x24   : > { %2396 = vmatpush.bf16.msra.mxu1 %v2248_v6  ;;  %2397 = vmatpush.bf16.msra.mxu2 %v2248_v6  ;;  %v2183_v60 = vld [vmem:[%s2475_s5 + $0x84] sm:$0xf]  ;;  %v1757_v61 = vld [vmem:[%s2475_s5 + $0x94] sm:$0xf0]  ;;  %v1763_v62 = vld [vmem:[%s2475_s5 + $0x88] sm:$0xf] }
  0x25   : > { %2398 = vmatpush.bf16.msra.mxu3 %v2248_v6  ;;  %1017 = vmatpush.bf16.msra.mxu0 %v2248_v6  ;;  %v1968_v6 = vor.u32 %v2239_v0, %v1967_v63  ;;  %v2186_v63 = vld [vmem:[%s2475_s5 + $0x98] sm:$0xf0] }
  0x28   : > { %2399 = vmatpush.bf16.msra.mxu1 %v2247_v7  ;;  %2400 = vmatpush.bf16.msra.mxu2 %v2247_v7 }
  0x29   : > { %2401 = vmatpush.bf16.msra.mxu3 %v2247_v7  ;;  %1018 = vmatpush.bf16.msra.mxu0 %v2247_v7  ;;  %v1728_v7 = vor.u32 %v2179_v2, %v1727_v1  ;;  %v1760_v2 = vor.u32 %v2183_v60, %v1757_v61 }
  0x2b   : > { %1039 = vmatmul.bf16.vlgmr.msra.gmra.mxu1 %v1768_v18  ;;  %1059 = vmatmul.bf16.vlgmr.msra.gmra.mxu2 %v1848_v19  ;;  %v1988_v18 = vor.u32 %v2244_v13, %v1987_v12  ;;  %v1748_v19 = vor.u32 %v2184_v15, %v1747_v14 }
  0x2c   : > { %1189 = vmatpush.bf16.msrb.mxu2 %v2270_v16  ;;  %1079 = vmatmul.bf16.vlgmr.msra.gmra.mxu3 %v1928_v20  ;;  %v1828_v16 = vor.u32 %v2204_v9, %v1827_v8  ;;  %v2167_v20 = vld [vmem:[%s2475_s5 + $0x4] sm:$0xf]  ;;  %v2188_v8 = vld [vmem:[%s2475_s5 + $0xac] sm:$0xf]  ;;  %v1777_v9 = vld [vmem:[%s2475_s5 + $0xbc] sm:$0xf0] }
  0x2d   : > { %1278 = vmatpush.bf16.msrb.mxu3 %v2278_v17  ;;  %1019 = vmatmul.bf16.vlgmr.msra.gmra.mxu0 %v1688_v21  ;;  %v1908_v17 = vor.u32 %v2224_v11, %v1907_v10  ;;  %v1689_v21 = vld [vmem:[%s2475_s5 + $0x14] sm:$0xf0]  ;;  %v1783_v10 = vld [vmem:[%s2475_s5 + $0xb0] sm:$0xf]  ;;  %v2191_v11 = vld [vmem:[%s2475_s5 + $0xc0] sm:$0xf0]  ;;  %v1780_v15 = vor.u32 %v2188_v8, %v1777_v9 }
  0x2e   : > { %1100 = vmatpush.bf16.msrb.mxu1 %v2262_v22  ;;  %1371 = vmatpush.bf16.msrb.mxu0 %v2282_v23  ;;  %v1695_v22 = vld [vmem:[%s2475_s5 + $0x8] sm:$0xf]  ;;  %v2170_v23 = vld [vmem:[%s2475_s5 + $0x18] sm:$0xf0] }
  0x30   : > { %1190 = vmatpush.bf16.msrb.mxu2 %v2269_v24  ;;  %v2168_v24 = vld [vmem:[%s2475_s5 + $0xc] sm:$0xf] }
  0x31   : > { %1279 = vmatpush.bf16.msrb.mxu3 %v2277_v25  ;;  %v1697_v25 = vld [vmem:[%s2475_s5 + $0x1c] sm:$0xf0] }
  0x32   : > { %1101 = vmatpush.bf16.msrb.mxu1 %v2261_v26  ;;  %1372 = vmatpush.bf16.msrb.mxu0 %v2281_v27  ;;  %v1703_v26 = vld [vmem:[%s2475_s5 + $0x10] sm:$0xf]  ;;  %v2171_v27 = vld [vmem:[%s2475_s5 + $0x20] sm:$0xf0] }
  0x34   : > { %1191 = vmatpush.bf16.msrb.mxu2 %v2268_v28  ;;  %v1692_v28 = vor.u32 %v2167_v20, %v1689_v21 }
  0x35   : > { %1280 = vmatpush.bf16.msrb.mxu3 %v2276_v29  ;;  %v1696_v29 = vor.u32 %v2170_v23, %v1695_v22  ;;  %v2192_v22 = vld [vmem:[%s2475_s5 + $0xcc] sm:$0xf]  ;;  %v1789_v23 = vld [vmem:[%s2475_s5 + $0xdc] sm:$0xf0] }
  0x36   : > { %1102 = vmatpush.bf16.msrb.mxu1 %v2260_v30  ;;  %1373 = vmatpush.bf16.msrb.mxu0 %v2280_v31  ;;  %v1700_v30 = vor.u32 %v2168_v24, %v1697_v25  ;;  %v1704_v31 = vor.u32 %v2171_v27, %v1703_v26  ;;  %v1795_v24 = vld [vmem:[%s2475_s5 + $0xd0] sm:$0xf]  ;;  %v2195_v25 = vld [vmem:[%s2475_s5 + $0xe0] sm:$0xf0]  ;;  %v2193_v26 = vld [vmem:[%s2475_s5 + $0xd4] sm:$0xf] }
  0x37   : > { %v1797_v27 = vld [vmem:[%s2475_s5 + $0xe4] sm:$0xf0] }
  0x38   : > { %1192 = vmatpush.bf16.msrb.mxu2 %v2267_v32  ;;  %v2172_v32 = vld [vmem:[%s2475_s5 + $0x2c] sm:$0xf]  ;;  %v1800_v35 = vor.u32 %v2193_v26, %v1797_v27  ;;  %v1855_v26 = vld [vmem:[%s2475_s5 + $0x148] sm:$0xf]  ;;  %v2210_v27 = vld [vmem:[%s2475_s5 + $0x158] sm:$0xf0] }
  0x39   : > { %1281 = vmatpush.bf16.msrb.mxu3 %v2275_v33  ;;  %v1709_v33 = vld [vmem:[%s2475_s5 + $0x3c] sm:$0xf0] }
  0x3a   : > { %1103 = vmatpush.bf16.msrb.mxu1 %v2259_v42  ;;  %1374 = vmatpush.bf16.msrb.mxu0 %v2279_v53  ;;  %v1712_v40 = vor.u32 %v2172_v32, %v1709_v33  ;;  %v1720_v42 = vor.u32 %v2173_v36, %v1717_v37  ;;  %v1792_v32 = vor.u32 %v2192_v22, %v1789_v23 }
  0x3b   : > { %1044 = vmatmul.bf16.gmra.mxu1 %v1788_v45  ;;  %1064 = vmatmul.bf16.gmra.mxu2 %v1868_v46  ;;  %v1729_v45 = vld [vmem:[%s2475_s5 + $0x64] sm:$0xf0]  ;;  %v1735_v46 = vld [vmem:[%s2475_s5 + $0x58] sm:$0xf]  ;;  %v1796_v33 = vor.u32 %v2195_v25, %v1795_v24  ;;  %v2207_v24 = vld [vmem:[%s2475_s5 + $0x144] sm:$0xf] }
  0x3c   : > { %1193 = vmatpush.bf16.msrb.mxu2 %v2266_v43  ;;  %1084 = vmatmul.bf16.gmra.mxu3 %v1948_v47  ;;  %v1724_v43 = vor.u32 %v2176_v39, %v1723_v38  ;;  %v2180_v47 = vld [vmem:[%s2475_s5 + $0x68] sm:$0xf0]  ;;  %v1849_v25 = vld [vmem:[%s2475_s5 + $0x154] sm:$0xf0] }
  0x3d   : > { %1282 = vmatpush.bf16.msrb.mxu3 %v2274_v44  ;;  %1024 = vmatmul.bf16.gmra.mxu0 %v1708_v48  ;;  %v2177_v44 = vld [vmem:[%s2475_s5 + $0x54] sm:$0xf]  ;;  %v2178_v48 = vld [vmem:[%s2475_s5 + $0x5c] sm:$0xf]  ;;  %v1736_v53 = vor.u32 %v2180_v47, %v1735_v46  ;;  %v1817_v47 = vld [vmem:[%s2475_s5 + $0x10c] sm:$0xf0] }
  0x3e   : > { %1104 = vmatpush.bf16.msrb.mxu1 %v2258_v49  ;;  %v1737_v49 = vld [vmem:[%s2475_s5 + $0x6c] sm:$0xf0]  ;;  %v2198_v46 = vld [vmem:[%s2475_s5 + $0xfc] sm:$0xf] }
  0x40   : > { %1194 = vmatpush.bf16.msrb.mxu2 %v2265_v50  ;;  %v1743_v50 = vld [vmem:[%s2475_s5 + $0x60] sm:$0xf] }
  0x41   : > { %1283 = vmatpush.bf16.msrb.mxu3 %v2273_v51  ;;  %v2181_v51 = vld [vmem:[%s2475_s5 + $0x70] sm:$0xf0] }
  0x42   : > { %1105 = vmatpush.bf16.msrb.mxu1 %v2257_v52  ;;  %v1732_v52 = vor.u32 %v2177_v44, %v1729_v45  ;;  %v1815_v44 = vld [vmem:[%s2475_s5 + $0xf8] sm:$0xf]  ;;  %v2200_v45 = vld [vmem:[%s2475_s5 + $0x108] sm:$0xf0] }
  0x44   : > { %1195 = vmatpush.bf16.msrb.mxu2 %v2264_v54  ;;  %v1740_v54 = vor.u32 %v2178_v48, %v1737_v49  ;;  %v1823_v48 = vld [vmem:[%s2475_s5 + $0x100] sm:$0xf]  ;;  %v2201_v49 = vld [vmem:[%s2475_s5 + $0x110] sm:$0xf0] }
  0x45   : > { %1284 = vmatpush.bf16.msrb.mxu3 %v2272_v55  ;;  %v1744_v55 = vor.u32 %v2181_v51, %v1743_v50 }
  0x46   : > { %1106 = vmatpush.bf16.msrb.mxu1 %v2256_v56  ;;  %v2182_v56 = vld [vmem:[%s2475_s5 + $0x7c] sm:$0xf] }
  0x48   : > { %1196 = vmatpush.bf16.msrb.mxu2 %v2263_v57  ;;  %v1749_v57 = vld [vmem:[%s2475_s5 + $0x8c] sm:$0xf0] }
  0x49   : > { %1285 = vmatpush.bf16.msrb.mxu3 %v2271_v58  ;;  %v1755_v58 = vld [vmem:[%s2475_s5 + $0x80] sm:$0xf]  ;;  %v1752_v0 = vor.u32 %v2182_v56, %v1749_v57  ;;  %v1824_v56 = vor.u32 %v2201_v49, %v1823_v48 }
  0x4a   : > { %1107 = vmatpush.bf16.msrb.mxu1 %v2255_v3  ;;  %v1756_v1 = vor.u32 %v2185_v59, %v1755_v58  ;;  %v1764_v3 = vor.u32 %v2186_v63, %v1763_v62  ;;  %v2202_v62 = vld [vmem:[%s2475_s5 + $0x11c] sm:$0xf]  ;;  %v1829_v63 = vld [vmem:[%s2475_s5 + $0x12c] sm:$0xf0] }
  0x4b   : > { %1049 = vmatmul.bf16.gmra.mxu1 %v1808_v4  ;;  %1069 = vmatmul.bf16.gmra.mxu2 %v1888_v5  ;;  %v2187_v4 = vld [vmem:[%s2475_s5 + $0xa4] sm:$0xf]  ;;  %v1769_v5 = vld [vmem:[%s2475_s5 + $0xb4] sm:$0xf0]  ;;  %v1832_v8 = vor.u32 %v2202_v62, %v1829_v63  ;;  %v2212_v63 = vld [vmem:[%s2475_s5 + $0x16c] sm:$0xf] }
  0x4c   : > { %1089 = vmatmul.bf16.gmra.mxu3 %v1968_v6  ;;  %v1775_v6 = vld [vmem:[%s2475_s5 + $0xa8] sm:$0xf]  ;;  %v1772_v12 = vor.u32 %v2187_v4, %v1769_v5  ;;  %v2206_v5 = vld [vmem:[%s2475_s5 + $0x138] sm:$0xf0] }
  0x4d   : > { %1029 = vmatmul.bf16.gmra.mxu0 %v1728_v7  ;;  %v2190_v7 = vld [vmem:[%s2475_s5 + $0xb8] sm:$0xf0]  ;;  %v1843_v4 = vld [vmem:[%s2475_s5 + $0x128] sm:$0xf] }
  0x4e   : > { %v1776_v13 = vor.u32 %v2190_v7, %v1775_v6 }
  0x5b   : > { %1054 = vmatmul.bf16.gmra.mxu1 %v1828_v16  ;;  %1074 = vmatmul.bf16.gmra.mxu2 %v1908_v17  ;;  %v1784_v16 = vor.u32 %v2191_v11, %v1783_v10 }
  0x5c   : > { %1094 = vmatmul.bf16.gmra.mxu3 %v1988_v18 }
  0x5d   : > { %1034 = vmatmul.bf16.gmra.mxu0 %v1748_v19 }
  0x6b   : > { %1108 = vmatmul.bf16.vlgmr.msrb.gmra.mxu1 %v1692_v28  ;;  %1197 = vmatmul.bf16.vlgmr.msrb.gmra.mxu2 %v1696_v29  ;;  %v1803_v28 = vld [vmem:[%s2475_s5 + $0xd8] sm:$0xf]  ;;  %v2196_v29 = vld [vmem:[%s2475_s5 + $0xe8] sm:$0xf0] }
  0x6c   : > { %1286 = vmatmul.bf16.vlgmr.msrb.gmra.mxu3 %v1700_v30  ;;  %v1804_v36 = vor.u32 %v2196_v29, %v1803_v28  ;;  %v2208_v28 = vld [vmem:[%s2475_s5 + $0x14c] sm:$0xf]  ;;  %v1857_v29 = vld [vmem:[%s2475_s5 + $0x15c] sm:$0xf0] }
  0x6d   : > { %2149 = vmatmul.msk.bf16.vlgmr.msrb.gmra.mxu0 %vm962_vm0, %v1704_v31 }
  0x7b   : > { %1113 = vmatmul.bf16.gmra.mxu1 %v1712_v40  ;;  %1202 = vmatmul.bf16.gmra.mxu2 %v1716_v41 }
  0x7c   : > { %1291 = vmatmul.bf16.gmra.mxu3 %v1720_v42  ;;  %v2197_v42 = vld [vmem:[%s2475_s5 + $0xf4] sm:$0xf] }
  0x7d   : > { %2150 = vmatmul.msk.bf16.gmra.mxu0 %vm962_vm0, %v1724_v43  ;;  %v1809_v43 = vld [vmem:[%s2475_s5 + $0x104] sm:$0xf0] }
  0x8b   : > { %1118 = vmatmul.bf16.gmra.mxu1 %v1732_v52  ;;  %1207 = vmatmul.bf16.gmra.mxu2 %v1736_v53  ;;  %v1812_v52 = vor.u32 %v2197_v42, %v1809_v43  ;;  %v1816_v53 = vor.u32 %v2200_v45, %v1815_v44  ;;  %v1852_v42 = vor.u32 %v2207_v24, %v1849_v25 }
  0x8c   : > { %1296 = vmatmul.bf16.gmra.mxu3 %v1740_v54  ;;  %v1856_v43 = vor.u32 %v2210_v27, %v1855_v26  ;;  %v1860_v45 = vor.u32 %v2208_v28, %v1857_v29 }
  0x8d   : > { %2151 = vmatmul.msk.bf16.gmra.mxu0 %vm962_vm0, %v1744_v55  ;;  %v1820_v55 = vor.u32 %v2198_v46, %v1817_v47 }
  0x9b   : > { %1123 = vmatmul.bf16.gmra.mxu1 %v1752_v0  ;;  %1212 = vmatmul.bf16.gmra.mxu2 %v1756_v1  ;;  %v1835_v0 = vld [vmem:[%s2475_s5 + $0x120] sm:$0xf]  ;;  %v2205_v1 = vld [vmem:[%s2475_s5 + $0x130] sm:$0xf0] }
  0x9c   : > { %1301 = vmatmul.bf16.gmra.mxu3 %v1760_v2  ;;  %v2203_v2 = vld [vmem:[%s2475_s5 + $0x124] sm:$0xf]  ;;  %v1836_v9 = vor.u32 %v2205_v1, %v1835_v0  ;;  %v1869_v0 = vld [vmem:[%s2475_s5 + $0x17c] sm:$0xf0]  ;;  %v1875_v1 = vld [vmem:[%s2475_s5 + $0x170] sm:$0xf] }
  0x9d   : > { %2152 = vmatmul.msk.bf16.gmra.mxu0 %vm962_vm0, %v1764_v3  ;;  %v1837_v3 = vld [vmem:[%s2475_s5 + $0x134] sm:$0xf0]  ;;  %v1872_v26 = vor.u32 %v2212_v63, %v1869_v0  ;;  %v1889_v63 = vld [vmem:[%s2475_s5 + $0x1a4] sm:$0xf0] }
  0x9e   : > { %v1840_v11 = vor.u32 %v2203_v2, %v1837_v3  ;;  %v2215_v2 = vld [vmem:[%s2475_s5 + $0x180] sm:$0xf0]  ;;  %v2213_v3 = vld [vmem:[%s2475_s5 + $0x174] sm:$0xf]  ;;  %v1895_v0 = vld [vmem:[%s2475_s5 + $0x198] sm:$0xf] }
  0x9f   : > { %v1876_v27 = vor.u32 %v2215_v2, %v1875_v1  ;;  %v2220_v1 = vld [vmem:[%s2475_s5 + $0x1a8] sm:$0xf0]  ;;  %v2218_v2 = vld [vmem:[%s2475_s5 + $0x19c] sm:$0xf] }
  0xa8   : > { %v2640_v14 = vpop.f32.mrf.mxu1 }
  0xaa   : > { %v2642_v17 = vpop.f32.mrf.mxu0 }
  0xab   : > { %1128 = vmatmul.bf16.gmra.mxu1 %v1772_v12  ;;  %1217 = vmatmul.bf16.gmra.mxu2 %v1776_v13  ;;  %v1844_v12 = vor.u32 %v2206_v5, %v1843_v4  ;;  %v1877_v5 = vld [vmem:[%s2475_s5 + $0x184] sm:$0xf0] }
  0xac   : > { %1306 = vmatmul.bf16.gmra.mxu3 %v1780_v15  ;;  %v1880_v29 = vor.u32 %v2213_v3, %v1877_v5  ;;  %v1903_v5 = vld [vmem:[%s2475_s5 + $0x1a0] sm:$0xf] }
  0xad   : > { %2153 = vmatmul.msk.bf16.gmra.mxu0 %vm962_vm0, %v1784_v16 }
  0xae   : > { %v2645_v18 = vpop.f32.mrf.mxu2 }
  0xaf   : > { %v2647_v19 = vpop.f32.mrf.mxu3 }
  0xb0   : > { %v2649_v20 = vpop.f32.mrf.mxu1 }
  0xb2   : > { %v2651_v21 = vpop.f32.mrf.mxu0 }
  0xb6   : > { %v2661_v30 = vpop.f32.mrf.mxu2 }
  0xb7   : > { %v2663_v31 = vpop.f32.mrf.mxu3 }
  0xb8   : > { %v2665_v34 = vpop.f32.mrf.mxu1 }
  0xba   : > { %v2667_v37 = vpop.f32.mrf.mxu0 }
  0xbb   : > { %1133 = vmatmul.bf16.gmra.mxu1 %v1792_v32  ;;  %1222 = vmatmul.bf16.gmra.mxu2 %v1796_v33  ;;  %v1863_v32 = vld [vmem:[%s2475_s5 + $0x150] sm:$0xf]  ;;  %v2211_v33 = vld [vmem:[%s2475_s5 + $0x160] sm:$0xf0] }
  0xbc   : > { %1311 = vmatmul.bf16.gmra.mxu3 %v1800_v35  ;;  %v1864_v46 = vor.u32 %v2211_v33, %v1863_v32 }
  0xbd   : > { %2154 = vmatmul.msk.bf16.gmra.mxu0 %vm962_vm0, %v1804_v36 }
  0xbe   : > { %v2670_v38 = vpop.f32.mrf.mxu2 }
  0xbf   : > { %v2672_v39 = vpop.f32.mrf.mxu3 }
  0xc0   : > { %v2674_v40 = vpop.f32.mrf.mxu1 }
  0xc2   : > { %v2676_v41 = vpop.f32.mrf.mxu0 }
  0xc6   : > { %v2686_v50 = vpop.f32.mrf.mxu2 }
  0xc7   : > { %v2688_v51 = vpop.f32.mrf.mxu3 }
  0xc8   : > { %v2690_v54 = vpop.f32.mrf.mxu1 }
  0xca   : > { %v2692_v57 = vpop.f32.mrf.mxu0 }
  0xcb   : > { %1138 = vmatmul.bf16.gmra.mxu1 %v1812_v52  ;;  %1227 = vmatmul.bf16.gmra.mxu2 %v1816_v53 }
  0xcc   : > { %1316 = vmatmul.bf16.gmra.mxu3 %v1820_v55 }
  0xcd   : > { %2155 = vmatmul.msk.bf16.gmra.mxu0 %vm962_vm0, %v1824_v56 }
  0xce   : > { %v2695_v58 = vpop.f32.mrf.mxu2 }
  0xcf   : > { %v2697_v59 = vpop.f32.mrf.mxu3 }
  0xd0   : > { %v2699_v60 = vpop.f32.mrf.mxu1 }
  0xd2   : > { %v2701_v61 = vpop.f32.mrf.mxu0 }
  0xd6   : > { %v2711_v6 = vpop.f32.mrf.mxu2 }
  0xd7   : > { %v2713_v7 = vpop.f32.mrf.mxu3 }
  0xd8   : > { %v2715_v10 = vpop.f32.mrf.mxu1 }
  0xda   : > { %v2717_v13 = vpop.f32.mrf.mxu0 }
  0xdb   : > { %1143 = vmatmul.bf16.gmra.mxu1 %v1832_v8  ;;  %1232 = vmatmul.bf16.gmra.mxu2 %v1836_v9  ;;  %v1883_v8 = vld [vmem:[%s2475_s5 + $0x178] sm:$0xf]  ;;  %v2216_v9 = vld [vmem:[%s2475_s5 + $0x188] sm:$0xf0] }
  0xdc   : > { %1321 = vmatmul.bf16.gmra.mxu3 %v1840_v11  ;;  %v1884_v32 = vor.u32 %v2216_v9, %v1883_v8  ;;  %v2221_v8 = vld [vmem:[%s2475_s5 + $0x1b0] sm:$0xf0] }
  0xdd   : > { %2156 = vmatmul.msk.bf16.gmra.mxu0 %vm962_vm0, %v1844_v12 }
  0xde   : > { %v2720_v15 = vpop.f32.mrf.mxu2 }
  0xdf   : > { %v2722_v16 = vpop.f32.mrf.mxu3 }
  0xe0   : > { %v2724_v22 = vpop.f32.mrf.mxu1 }
  0xe2   : > { %v2726_v23 = vpop.f32.mrf.mxu0 }
  0xe6   : > { %v2736_v35 = vpop.f32.mrf.mxu2 }
  0xe7   : > { %v2738_v36 = vpop.f32.mrf.mxu3 }
  0xe8   : > { %v1109_v44 = vpop.f32.mrf.mxu1 }
  0xe9   : > { %v1110_v48 = vadd.f32 %v1109_v44, %v2642_v17  ;;  %v2754_v17 = vld [vmem:[%s2900_s2] ss:$0 sm:$0xff] }
  0xea   : > { %v1376_v47 = vpop.f32.mrf.mxu0 }
  0xeb   : > { %1148 = vmatmul.bf16.gmra.mxu1 %v1852_v42  ;;  %1237 = vmatmul.bf16.gmra.mxu2 %v1856_v43 }
  0xec   : > { %1326 = vmatmul.bf16.gmra.mxu3 %v1860_v45 }
  0xed   : > { %2157 = vmatmul.msk.bf16.gmra.mxu0 %vm962_vm0, %v1864_v46 }
  0xee   : > { %v1198_v49 = vpop.f32.mrf.mxu2 }
  0xef   : > { %v1199_v52 = vadd.f32 %v1198_v49, %v1110_v48  ;;  %v1287_v53 = vpop.f32.mrf.mxu3 }
  0xf0   : > { %v1111_v55 = vpop.f32.mrf.mxu1 }
  0xf1   : > { %v1288_v62 = vadd.f32 %v1287_v53, %v1199_v52  ;;  %v1112_v4 = vadd.f32 %v1111_v55, %v2651_v21 }
  0xf2   : > { %v1378_v56 = vpop.f32.mrf.mxu0 }
  0xf3   : > { %v1377_v12 = vadd.f32 %v1376_v47, %v1288_v62  ;;  %v2217_v62 = vld [vmem:[%s2475_s5 + $0x194] sm:$0xf] }
  0xf5   : > { %v1492_v42 = vmul.f32 %v2754_v17, %v1377_v12  ;;  %vm1457_vm1 = vcmp.ge.f32.partialorder %v1377_v12, 0.0 }
  0xf6   : > { %v1200_v11 = vpop.f32.mrf.mxu2 }
  0xf7   : > { %v1201_v24 = vadd.f32 %v1200_v11, %v1112_v4  ;;  %v1289_v25 = vpop.f32.mrf.mxu3  ;;  %v1524_v47 = vsel %vm1457_vm1, %v1377_v12, %v1492_v42  ;;  %v1897_v4 = vld [vmem:[%s2475_s5 + $0x1ac] sm:$0xf0] }
  0xf8   : > { %v1114_v28 = vpop.f32.mrf.mxu1 }
  0xf9   : > { %v1290_v33 = vadd.f32 %v1289_v25, %v1201_v24  ;;  %v1115_v45 = vadd.f32 %v1114_v28, %v2667_v37  ;;  %v1892_v25 = vor.u32 %v2217_v62, %v1889_v63  ;;  %v1900_v28 = vor.u32 %v2218_v2, %v1897_v4  ;;  %v1915_v62 = vld [vmem:[%s2475_s5 + $0x1c0] sm:$0xf]  ;;  %v2225_v63 = vld [vmem:[%s2475_s5 + $0x1d0] sm:$0xf0]  ;;  %v1923_v2 = vld [vmem:[%s2475_s5 + $0x1c8] sm:$0xf] }
  0xfa   : > { %v1381_v21 = vpop.f32.mrf.mxu0 }
  0xfb   : > { %v1379_v43 = vadd.f32 %v1378_v56, %v1290_v33  ;;  %1153 = vmatmul.bf16.gmra.mxu1 %v1872_v26  ;;  %1242 = vmatmul.bf16.gmra.mxu2 %v1876_v27  ;;  %v1896_v26 = vor.u32 %v2220_v1, %v1895_v0  ;;  %v2223_v0 = vld [vmem:[%s2475_s5 + $0x1c4] sm:$0xf]  ;;  %v1917_v1 = vld [vmem:[%s2475_s5 + $0x1d4] sm:$0xf0] }
  0xfc   : > { %1331 = vmatmul.bf16.gmra.mxu3 %v1880_v29  ;;  %v1904_v29 = vor.u32 %v2221_v8, %v1903_v5 }
  0xfd   : > { %2158 = vmatmul.msk.bf16.gmra.mxu0 %vm962_vm0, %v1884_v32  ;;  %vm1458_vm2 = vcmp.ge.f32.partialorder %v1379_v43, 0.0  ;;  %v1493_v44 = vmul.f32 %v2754_v17, %v1379_v43 }
  0xfe   : > { %v1203_v46 = vpop.f32.mrf.mxu2 }
  0xff   : > { %v1525_v48 = vsel %vm1458_vm2, %v1379_v43, %v1493_v44  ;;  %v1204_v49 = vadd.f32 %v1203_v46, %v1115_v45  ;;  %v1292_v52 = vpop.f32.mrf.mxu3 }
 0x100   : > { %v2286_v53 = vpack.c.bf16 %v1525_v48, %v1524_v47  ;;  %v1116_v55 = vpop.f32.mrf.mxu1 }
 0x101   : > { %v1293_v37 = vadd.f32 %v1292_v52, %v1204_v49  ;;  %v1117_v3 = vadd.f32 %v1116_v55, %v2676_v41 }
 0x102   : > { %v1383_v56 = vpop.f32.mrf.mxu0  ;;  %2287 = vst [vmem:[%s2764_s20] sm:$0xff] %v2286_v53  }
 0x103   : > { %v1382_v11 = vadd.f32 %v1381_v21, %v1293_v37  ;;  %v1909_v37 = vld [vmem:[%s2475_s5 + $0x1cc] sm:$0xf0] }
 0x105   : > { %v1494_v42 = vmul.f32 %v2754_v17, %v1382_v11  ;;  %vm1459_vm3 = vcmp.ge.f32.partialorder %v1382_v11, 0.0 }
 0x106   : > { %v1205_v9 = vpop.f32.mrf.mxu2 }
 0x107   : > { %v1206_v12 = vadd.f32 %v1205_v9, %v1117_v3  ;;  %v1294_v24 = vpop.f32.mrf.mxu3  ;;  %v1526_v45 = vsel %vm1459_vm3, %v1382_v11, %v1494_v42  ;;  %v2226_v3 = vld [vmem:[%s2475_s5 + $0x1d8] sm:$0xf0] }
 0x108   : > { %v1119_v27 = vpop.f32.mrf.mxu1 }
 0x109   : > { %v1295_v32 = vadd.f32 %v1294_v24, %v1206_v12  ;;  %v1120_v21 = vadd.f32 %v1119_v27, %v2692_v57  ;;  %v1916_v12 = vor.u32 %v2225_v63, %v1915_v62  ;;  %v1943_v62 = vld [vmem:[%s2475_s5 + $0x1f0] sm:$0xf]  ;;  %v2231_v63 = vld [vmem:[%s2475_s5 + $0x200] sm:$0xf0] }
 0x10a   : > { %v1386_v33 = vpop.f32.mrf.mxu0 }
 0x10b   : > { %v1384_v43 = vadd.f32 %v1383_v56, %v1295_v32  ;;  %1158 = vmatmul.bf16.gmra.mxu1 %v1892_v25  ;;  %1247 = vmatmul.bf16.gmra.mxu2 %v1896_v26  ;;  %v2222_v56 = vld [vmem:[%s2475_s5 + $0x1bc] sm:$0xf]  ;;  %v1920_v25 = vor.u32 %v2223_v0, %v1917_v1  ;;  %v1924_v26 = vor.u32 %v2226_v3, %v1923_v2 }
 0x10c   : > { %1336 = vmatmul.bf16.gmra.mxu3 %v1900_v28  ;;  %v1912_v11 = vor.u32 %v2222_v56, %v1909_v37  ;;  %v2228_v56 = vld [vmem:[%s2475_s5 + $0x1ec] sm:$0xf]  ;;  %v1937_v37 = vld [vmem:[%s2475_s5 + $0x1fc] sm:$0xf0] }
 0x10d   : > { %2159 = vmatmul.msk.bf16.gmra.mxu0 %vm962_vm0, %v1904_v29  ;;  %vm1460_vm4 = vcmp.ge.f32.partialorder %v1384_v43, 0.0  ;;  %v1495_v41 = vmul.f32 %v2754_v17, %v1384_v43 }
 0x10e   : > { %v1208_v44 = vpop.f32.mrf.mxu2 }
 0x10f   : > { %v1527_v46 = vsel %vm1460_vm4, %v1384_v43, %v1495_v41  ;;  %v1209_v47 = vadd.f32 %v1208_v44, %v1120_v21  ;;  %v1297_v48 = vpop.f32.mrf.mxu3 }
 0x110   : > { %v2291_v49 = vpack.c.bf16 %v1527_v46, %v1526_v45  ;;  %v1121_v52 = vpop.f32.mrf.mxu1 }
 0x111   : > { %v1298_v55 = vadd.f32 %v1297_v48, %v1209_v47  ;;  %v1122_v57 = vadd.f32 %v1121_v52, %v2701_v61  ;;  %v1929_v52 = vld [vmem:[%s2475_s5 + $0x1f4] sm:$0xf0] }
 0x112   : > { %v1388_v53 = vpop.f32.mrf.mxu0  ;;  %2363 = vst [vmem:[%s2764_s20 + $0x8] sm:$0xff] %v2291_v49   ;;  %v2227_v49 = vld [vmem:[%s2475_s5 + $0x1e4] sm:$0xf] }
 0x113   : > { %v1387_v5 = vadd.f32 %v1386_v33, %v1298_v55  ;;  %v2230_v55 = vld [vmem:[%s2475_s5 + $0x1f8] sm:$0xf0]  ;;  %v1932_v3 = vor.u32 %v2227_v49, %v1929_v52  ;;  %v1963_v49 = vld [vmem:[%s2475_s5 + $0x218] sm:$0xf]  ;;  %v2236_v52 = vld [vmem:[%s2475_s5 + $0x228] sm:$0xf0] }
 0x115   : > { %v1496_v29 = vmul.f32 %v2754_v17, %v1387_v5  ;;  %vm1461_vm5 = vcmp.ge.f32.partialorder %v1387_v5, 0.0 }
 0x116   : > { %v1210_v4 = vpop.f32.mrf.mxu2 }
 0x117   : > { %v1211_v8 = vadd.f32 %v1210_v4, %v1122_v57  ;;  %v1299_v9 = vpop.f32.mrf.mxu3  ;;  %v1528_v43 = vsel %vm1461_vm5, %v1387_v5, %v1496_v29 }
 0x118   : > { %v1124_v24 = vpop.f32.mrf.mxu1 }
 0x119   : > { %v1300_v27 = vadd.f32 %v1299_v9, %v1211_v8  ;;  %v1125_v33 = vadd.f32 %v1124_v24, %v2717_v13  ;;  %v1940_v8 = vor.u32 %v2228_v56, %v1937_v37  ;;  %v1944_v9 = vor.u32 %v2231_v63, %v1943_v62 }
 0x11a   : > { %v1391_v28 = vpop.f32.mrf.mxu0 }
 0x11b   : > { %v1389_v32 = vadd.f32 %v1388_v53, %v1300_v27  ;;  %1163 = vmatmul.bf16.gmra.mxu1 %v1912_v11  ;;  %1252 = vmatmul.bf16.gmra.mxu2 %v1916_v12  ;;  %v1935_v53 = vld [vmem:[%s2475_s5 + $0x1e8] sm:$0xf] }
 0x11c   : > { %1341 = vmatmul.bf16.gmra.mxu3 %v1920_v25  ;;  %v1936_v4 = vor.u32 %v2230_v55, %v1935_v53 }
 0x11d   : > { %2160 = vmatmul.msk.bf16.gmra.mxu0 %vm962_vm0, %v1924_v26  ;;  %vm1462_vm6 = vcmp.ge.f32.partialorder %v1389_v32, 0.0  ;;  %v1497_v61 = vmul.f32 %v2754_v17, %v1389_v32 }
 0x11e   : > { %v1213_v42 = vpop.f32.mrf.mxu2 }
 0x11f   : > { %v1529_v41 = vsel %vm1462_vm6, %v1389_v32, %v1497_v61  ;;  %v1214_v21 = vadd.f32 %v1213_v42, %v1125_v33  ;;  %v1302_v44 = vpop.f32.mrf.mxu3 }
 0x120   : > { %v2296_v45 = vpack.c.bf16 %v1529_v41, %v1528_v43  ;;  %v1126_v46 = vpop.f32.mrf.mxu1 }
 0x121   : > { %v1303_v48 = vadd.f32 %v1302_v44, %v1214_v21  ;;  %v1127_v13 = vadd.f32 %v1126_v46, %v2726_v23  ;;  %v2232_v21 = vld [vmem:[%s2475_s5 + $0x20c] sm:$0xf]  ;;  %v1949_v44 = vld [vmem:[%s2475_s5 + $0x21c] sm:$0xf0]  ;;  %v2235_v46 = vld [vmem:[%s2475_s5 + $0x220] sm:$0xf0] }
 0x122   : > { %v1393_v47 = vpop.f32.mrf.mxu0  ;;  %2364 = vst [vmem:[%s2764_s20 + $0x10] sm:$0xff] %v2296_v45   ;;  %v1955_v45 = vld [vmem:[%s2475_s5 + $0x210] sm:$0xf]  ;;  %v1952_v37 = vor.u32 %v2232_v21, %v1949_v44 }
 0x123   : > { %v1392_v57 = vadd.f32 %v1391_v28, %v1303_v48  ;;  %v1957_v48 = vld [vmem:[%s2475_s5 + $0x224] sm:$0xf0]  ;;  %v1956_v62 = vor.u32 %v2235_v46, %v1955_v45 }
 0x125   : > { %v1498_v24 = vmul.f32 %v2754_v17, %v1392_v57  ;;  %vm1463_vm7 = vcmp.ge.f32.partialorder %v1392_v57, 0.0 }
 0x126   : > { %v1215_v0 = vpop.f32.mrf.mxu2 }
 0x127   : > { %v1216_v1 = vadd.f32 %v1215_v0, %v1127_v13  ;;  %v1304_v2 = vpop.f32.mrf.mxu3  ;;  %v1530_v28 = vsel %vm1463_vm7, %v1392_v57, %v1498_v24  ;;  %v1964_v57 = vor.u32 %v2236_v52, %v1963_v49 }
 0x128   : > { %v1129_v5 = vpop.f32.mrf.mxu1 }
 0x129   : > { %v1305_v11 = vadd.f32 %v1304_v2, %v1216_v1  ;;  %v1130_v26 = vadd.f32 %v1129_v5, %v2640_v14 }
 0x12a   : > { %v1396_v12 = vpop.f32.mrf.mxu0 }
 0x12b   : > { %v1394_v25 = vadd.f32 %v1393_v47, %v1305_v11  ;;  %1168 = vmatmul.bf16.gmra.mxu1 %v1932_v3  ;;  %1257 = vmatmul.bf16.gmra.mxu2 %v1936_v4  ;;  %v2233_v47 = vld [vmem:[%s2475_s5 + $0x214] sm:$0xf] }
 0x12c   : > { %1346 = vmatmul.bf16.gmra.mxu3 %v1940_v8  ;;  %v1960_v0 = vor.u32 %v2233_v47, %v1957_v48 }
 0x12d   : > { %2161 = vmatmul.msk.bf16.gmra.mxu0 %vm962_vm0, %v1944_v9  ;;  %vm1464_vm8 = vcmp.ge.f32.partialorder %v1394_v25, 0.0  ;;  %v1499_v23 = vmul.f32 %v2754_v17, %v1394_v25 }
 0x12e   : > { %v1218_v27 = vpop.f32.mrf.mxu2 }
 0x12f   : > { %v1531_v29 = vsel %vm1464_vm8, %v1394_v25, %v1499_v23  ;;  %v1219_v32 = vadd.f32 %v1218_v27, %v1130_v26  ;;  %v1307_v61 = vpop.f32.mrf.mxu3 }
 0x130   : > { %v2301_v33 = vpack.c.bf16 %v1531_v29, %v1530_v28  ;;  %v1131_v42 = vpop.f32.mrf.mxu1  ;;  %v2237_v28 = vld [vmem:[%s2475_s5 + $0x234] sm:$0xf]  ;;  %v1969_v29 = vld [vmem:[%s2475_s5 + $0x244] sm:$0xf0] }
 0x131   : > { %v1308_v41 = vadd.f32 %v1307_v61, %v1219_v32  ;;  %v1132_v14 = vadd.f32 %v1131_v42, %v2649_v20  ;;  %v1975_v32 = vld [vmem:[%s2475_s5 + $0x238] sm:$0xf]  ;;  %v2240_v61 = vld [vmem:[%s2475_s5 + $0x248] sm:$0xf0]  ;;  %v1977_v42 = vld [vmem:[%s2475_s5 + $0x24c] sm:$0xf0]  ;;  %v1972_v47 = vor.u32 %v2237_v28, %v1969_v29 }
 0x132   : > { %v1398_v43 = vpop.f32.mrf.mxu0  ;;  %2365 = vst [vmem:[%s2764_s20 + $0x18] sm:$0xff] %v2301_v33   ;;  %v2238_v33 = vld [vmem:[%s2475_s5 + $0x23c] sm:$0xf] }
 0x133   : > { %v1397_v55 = vadd.f32 %v1396_v12, %v1308_v41  ;;  %v2241_v41 = vld [vmem:[%s2475_s5 + $0x250] sm:$0xf0]  ;;  %v1980_v49 = vor.u32 %v2238_v33, %v1977_v42 }
 0x135   : > { %v1500_v3 = vmul.f32 %v2754_v17, %v1397_v55  ;;  %vm1465_vm9 = vcmp.ge.f32.partialorder %v1397_v55, 0.0 }
 0x136   : > { %v1220_v53 = vpop.f32.mrf.mxu2 }
 0x137   : > { %v1221_v56 = vadd.f32 %v1220_v53, %v1132_v14  ;;  %v1309_v13 = vpop.f32.mrf.mxu3  ;;  %v1532_v9 = vsel %vm1465_vm9, %v1397_v55, %v1500_v3  ;;  %v1976_v14 = vor.u32 %v2240_v61, %v1975_v32 }
 0x138   : > { %v1134_v63 = vpop.f32.mrf.mxu1 }
 0x139   : > { %v1310_v1 = vadd.f32 %v1309_v13, %v1221_v56  ;;  %v1135_v5 = vadd.f32 %v1134_v63, %v2665_v34 }
 0x13a   : > { %v1401_v2 = vpop.f32.mrf.mxu0 }
 0x13b   : > { %v1399_v4 = vadd.f32 %v1398_v43, %v1310_v1  ;;  %1173 = vmatmul.bf16.gmra.mxu1 %v1952_v37  ;;  %1262 = vmatmul.bf16.gmra.mxu2 %v1956_v62  ;;  %v1983_v43 = vld [vmem:[%s2475_s5 + $0x240] sm:$0xf] }
 0x13c   : > { %1351 = vmatmul.bf16.gmra.mxu3 %v1960_v0  ;;  %v1984_v52 = vor.u32 %v2241_v41, %v1983_v43 }
 0x13d   : > { %2162 = vmatmul.msk.bf16.gmra.mxu0 %vm962_vm0, %v1964_v57  ;;  %vm1466_vm10 = vcmp.ge.f32.partialorder %v1399_v4, 0.0  ;;  %v1501_v20 = vmul.f32 %v2754_v17, %v1399_v4 }
 0x13e   : > { %v1223_v8 = vpop.f32.mrf.mxu2 }
 0x13f   : > { %v1533_v11 = vsel %vm1466_vm10, %v1399_v4, %v1501_v20  ;;  %v1224_v12 = vadd.f32 %v1223_v8, %v1135_v5  ;;  %v1312_v24 = vpop.f32.mrf.mxu3  ;;  %v2242_v5 = vld [vmem:[%s2475_s5 + $0x25c] sm:$0xf]  ;;  %v1989_v8 = vld [vmem:[%s2475_s5 + $0x26c] sm:$0xf0] }
 0x140   : > { %v2306_v25 = vpack.c.bf16 %v1533_v11, %v1532_v9  ;;  %v1136_v23 = vpop.f32.mrf.mxu1  ;;  %v1995_v9 = vld [vmem:[%s2475_s5 + $0x260] sm:$0xf]  ;;  %v2245_v11 = vld [vmem:[%s2475_s5 + $0x270] sm:$0xf0]  ;;  %v1992_v32 = vor.u32 %v2242_v5, %v1989_v8 }
 0x141   : > { %v1313_v27 = vadd.f32 %v1312_v24, %v1224_v12  ;;  %v1137_v34 = vadd.f32 %v1136_v23, %v2674_v40  ;;  %v2243_v12 = vld [vmem:[%s2475_s5 + $0x264] sm:$0xf]  ;;  %v1997_v24 = vld [vmem:[%s2475_s5 + $0x274] sm:$0xf0]  ;;  %v2246_v23 = vld [vmem:[%s2475_s5 + $0x278] sm:$0xf0]  ;;  %v1996_v61 = vor.u32 %v2245_v11, %v1995_v9 }
 0x142   : > { %v1403_v26 = vpop.f32.mrf.mxu0  ;;  %2366 = vst [vmem:[%s2764_s20 + $0x20] sm:$0xff] %v2306_v25   ;;  %v2003_v25 = vld [vmem:[%s2475_s5 + $0x268] sm:$0xf] }
 0x143   : > { %v1402_v44 = vadd.f32 %v1401_v2, %v1313_v27  ;;  %v2004_v42 = vor.u32 %v2246_v23, %v2003_v25 }
 0x145   : > { %v1502_v56 = vmul.f32 %v2754_v17, %v1402_v44  ;;  %vm1467_vm11 = vcmp.ge.f32.partialorder %v1402_v44, 0.0 }
 0x146   : > { %v1225_v21 = vpop.f32.mrf.mxu2 }
 0x147   : > { %v1226_v45 = vadd.f32 %v1225_v21, %v1137_v34  ;;  %v1314_v46 = vpop.f32.mrf.mxu3  ;;  %v1534_v63 = vsel %vm1467_vm11, %v1402_v44, %v1502_v56  ;;  %v2000_v34 = vor.u32 %v2243_v12, %v1997_v24 }
 0x148   : > { %v1139_v48 = vpop.f32.mrf.mxu1 }
 0x149   : > { %v1315_v53 = vadd.f32 %v1314_v46, %v1226_v45  ;;  %v1140_v37 = vadd.f32 %v1139_v48, %v2690_v54 }
 0x14a   : > { %v1406_v55 = vpop.f32.mrf.mxu0 }
 0x14b   : > { %v1404_v13 = vadd.f32 %v1403_v26, %v1315_v53  ;;  %1178 = vmatmul.bf16.gmra.mxu1 %v1972_v47  ;;  %1267 = vmatmul.bf16.gmra.mxu2 %v1976_v14 }
 0x14c   : > { %1356 = vmatmul.bf16.gmra.mxu3 %v1980_v49 }
 0x14d   : > { %2163 = vmatmul.msk.bf16.gmra.mxu0 %vm962_vm0, %v1984_v52  ;;  %vm1468_vm12 = vcmp.ge.f32.partialorder %v1404_v13, 0.0  ;;  %v1503_v40 = vmul.f32 %v2754_v17, %v1404_v13 }
 0x14e   : > { %v1228_v62 = vpop.f32.mrf.mxu2 }
 0x14f   : > { %v1535_v0 = vsel %vm1468_vm12, %v1404_v13, %v1503_v40  ;;  %v1229_v57 = vadd.f32 %v1228_v62, %v1140_v37  ;;  %v1317_v1 = vpop.f32.mrf.mxu3 }
 0x150   : > { %v2311_v2 = vpack.c.bf16 %v1535_v0, %v1534_v63  ;;  %v1141_v3 = vpop.f32.mrf.mxu1 }
 0x151   : > { %v1318_v20 = vadd.f32 %v1317_v1, %v1229_v57  ;;  %v1142_v54 = vadd.f32 %v1141_v3, %v2699_v60 }
 0x152   : > { %v1408_v4 = vpop.f32.mrf.mxu0  ;;  %2367 = vst [vmem:[%s2764_s20 + $0x28] sm:$0xff] %v2311_v2  }
 0x153   : > { %v1407_v27 = vadd.f32 %v1406_v55, %v1318_v20 }
 0x155   : > { %v1504_v21 = vmul.f32 %v2754_v17, %v1407_v27  ;;  %vm1469_vm13 = vcmp.ge.f32.partialorder %v1407_v27, 0.0 }
 0x156   : > { %v1230_v26 = vpop.f32.mrf.mxu2 }
 0x157   : > { %v1231_v28 = vadd.f32 %v1230_v26, %v1142_v54  ;;  %v1319_v29 = vpop.f32.mrf.mxu3  ;;  %v1536_v47 = vsel %vm1469_vm13, %v1407_v27, %v1504_v21 }
 0x158   : > { %v1144_v33 = vpop.f32.mrf.mxu1 }
 0x159   : > { %v1320_v43 = vadd.f32 %v1319_v29, %v1231_v28  ;;  %v1145_v45 = vadd.f32 %v1144_v33, %v2715_v10 }
 0x15a   : > { %v1411_v41 = vpop.f32.mrf.mxu0 }
 0x15b   : > { %v1409_v44 = vadd.f32 %v1408_v4, %v1320_v43  ;;  %1183 = vmatmul.bf16.gmra.mxu1 %v1992_v32  ;;  %1272 = vmatmul.bf16.gmra.mxu2 %v1996_v61 }
 0x15c   : > { %1361 = vmatmul.bf16.gmra.mxu3 %v2000_v34 }
 0x15d   : > { %2164 = vmatmul.msk.bf16.gmra.mxu0 %vm962_vm0, %v2004_v42  ;;  %vm1470_vm14 = vcmp.ge.f32.partialorder %v1409_v44, 0.0  ;;  %v1505_v60 = vmul.f32 %v2754_v17, %v1409_v44 }
 0x15e   : > { %v1233_v46 = vpop.f32.mrf.mxu2 }
 0x15f   : > { %v1537_v14 = vsel %vm1470_vm14, %v1409_v44, %v1505_v60  ;;  %v1234_v48 = vadd.f32 %v1233_v46, %v1145_v45  ;;  %v1322_v49 = vpop.f32.mrf.mxu3 }
 0x160   : > { %v2316_v52 = vpack.c.bf16 %v1537_v14, %v1536_v47  ;;  %v1146_v53 = vpop.f32.mrf.mxu1 }
 0x161   : > { %v1323_v56 = vadd.f32 %v1322_v49, %v1234_v48  ;;  %v1147_v13 = vadd.f32 %v1146_v53, %v2724_v22 }
 0x162   : > { %v1413_v55 = vpop.f32.mrf.mxu0  ;;  %2368 = vst [vmem:[%s2764_s20 + $0x30] sm:$0xff] %v2316_v52  }
 0x163   : > { %v1412_v37 = vadd.f32 %v1411_v41, %v1323_v56 }
 0x165   : > { %v1506_v1 = vmul.f32 %v2754_v17, %v1412_v37  ;;  %vm1471_vm15 = vcmp.ge.f32.partialorder %v1412_v37, 0.0 }
 0x166   : > { %v1235_v40 = vpop.f32.mrf.mxu2 }
 0x167   : > { %v1236_v62 = vadd.f32 %v1235_v40, %v1147_v13  ;;  %v1324_v63 = vpop.f32.mrf.mxu3  ;;  %v1538_v5 = vsel %vm1471_vm15, %v1412_v37, %v1506_v1 }
 0x168   : > { %v1149_v0 = vpop.f32.mrf.mxu1 }
 0x169   : > { %v1325_v57 = vadd.f32 %v1324_v63, %v1236_v62  ;;  %v1150_v4 = vadd.f32 %v1149_v0, %v2645_v18 }
 0x16a   : > { %v1416_v10 = vpop.f32.mrf.mxu0 }
 0x16b   : > { %v1414_v2 = vadd.f32 %v1413_v55, %v1325_v57 }
 0x16d   : > { %vm1472_vm0 = vcmp.ge.f32.partialorder %v1414_v2, 0.0  ;;  %v1507_v3 = vmul.f32 %v2754_v17, %v1414_v2 }
 0x16e   : > { %v1238_v20 = vpop.f32.mrf.mxu2 }
 0x16f   : > { %v1539_v22 = vsel %vm1472_vm0, %v1414_v2, %v1507_v3  ;;  %v1239_v8 = vadd.f32 %v1238_v20, %v1150_v4  ;;  %v1327_v9 = vpop.f32.mrf.mxu3 }
 0x170   : > { %v2321_v11 = vpack.c.bf16 %v1539_v22, %v1538_v5  ;;  %v1151_v12 = vpop.f32.mrf.mxu1 }
 0x171   : > { %v1328_v24 = vadd.f32 %v1327_v9, %v1239_v8  ;;  %v1152_v25 = vadd.f32 %v1151_v12, %v2661_v30 }
 0x172   : > { %v1418_v54 = vpop.f32.mrf.mxu0  ;;  %2369 = vst [vmem:[%s2764_s20 + $0x38] sm:$0xff] %v2321_v11  }
 0x173   : > { %v1417_v26 = vadd.f32 %v1416_v10, %v1328_v24 }
 0x175   : > { %v1508_v61 = vmul.f32 %v2754_v17, %v1417_v26  ;;  %vm1473_vm1 = vcmp.ge.f32.partialorder %v1417_v26, 0.0 }
 0x176   : > { %v1240_v23 = vpop.f32.mrf.mxu2 }
 0x177   : > { %v1241_v27 = vadd.f32 %v1240_v23, %v1152_v25  ;;  %v1329_v28 = vpop.f32.mrf.mxu3  ;;  %v1540_v41 = vsel %vm1473_vm1, %v1417_v26, %v1508_v61 }
 0x178   : > { %v1154_v29 = vpop.f32.mrf.mxu1 }
 0x179   : > { %v1330_v32 = vadd.f32 %v1329_v28, %v1241_v27  ;;  %v1155_v42 = vadd.f32 %v1154_v29, %v2670_v38 }
 0x17a   : > { %v1421_v18 = vpop.f32.mrf.mxu0 }
 0x17b   : > { %v1419_v33 = vadd.f32 %v1418_v54, %v1330_v32 }
 0x17d   : > { %vm1474_vm2 = vcmp.ge.f32.partialorder %v1419_v33, 0.0  ;;  %v1509_v34 = vmul.f32 %v2754_v17, %v1419_v33 }
 0x17e   : > { %v1243_v43 = vpop.f32.mrf.mxu2 }
 0x17f   : > { %v1541_v30 = vsel %vm1474_vm2, %v1419_v33, %v1509_v34  ;;  %v1244_v21 = vadd.f32 %v1243_v43, %v1155_v42  ;;  %v1332_v44 = vpop.f32.mrf.mxu3 }
 0x180   : > { %v2326_v60 = vpack.c.bf16 %v1541_v30, %v1540_v41  ;;  %v1156_v45 = vpop.f32.mrf.mxu1 }
 0x181   : > { %v1333_v47 = vadd.f32 %v1332_v44, %v1244_v21  ;;  %v1157_v14 = vadd.f32 %v1156_v45, %v2686_v50 }
 0x182   : > { %v1423_v46 = vpop.f32.mrf.mxu0  ;;  %2370 = vst [vmem:[%s2764_s20 + $0x40] sm:$0xff] %v2326_v60  }
 0x183   : > { %v1422_v49 = vadd.f32 %v1421_v18, %v1333_v47 }
 0x185   : > { %v1510_v13 = vmul.f32 %v2754_v17, %v1422_v49  ;;  %vm1475_vm3 = vcmp.ge.f32.partialorder %v1422_v49, 0.0 }
 0x186   : > { %v1245_v48 = vpop.f32.mrf.mxu2 }
 0x187   : > { %v1246_v52 = vadd.f32 %v1245_v48, %v1157_v14  ;;  %v1334_v53 = vpop.f32.mrf.mxu3  ;;  %v1542_v0 = vsel %vm1475_vm3, %v1422_v49, %v1510_v13 }
 0x188   : > { %v1159_v55 = vpop.f32.mrf.mxu1 }
 0x189   : > { %v1335_v56 = vadd.f32 %v1334_v53, %v1246_v52  ;;  %v1160_v62 = vadd.f32 %v1159_v55, %v2695_v58 }
 0x18a   : > { %v1426_v38 = vpop.f32.mrf.mxu0 }
 0x18b   : > { %v1424_v40 = vadd.f32 %v1423_v46, %v1335_v56 }
 0x18d   : > { %vm1476_vm4 = vcmp.ge.f32.partialorder %v1424_v40, 0.0  ;;  %v1511_v37 = vmul.f32 %v2754_v17, %v1424_v40 }
 0x18e   : > { %v1248_v63 = vpop.f32.mrf.mxu2 }
 0x18f   : > { %v1543_v50 = vsel %vm1476_vm4, %v1424_v40, %v1511_v37  ;;  %v1249_v57 = vadd.f32 %v1248_v63, %v1160_v62  ;;  %v1337_v10 = vpop.f32.mrf.mxu3 }
 0x190   : > { %v2331_v1 = vpack.c.bf16 %v1543_v50, %v1542_v0  ;;  %v1161_v2 = vpop.f32.mrf.mxu1 }
 0x191   : > { %v1338_v4 = vadd.f32 %v1337_v10, %v1249_v57  ;;  %v1162_v20 = vadd.f32 %v1161_v2, %v2711_v6 }
 0x192   : > { %v1428_v3 = vpop.f32.mrf.mxu0  ;;  %2371 = vst [vmem:[%s2764_s20 + $0x48] sm:$0xff] %v2331_v1  }
 0x193   : > { %v1427_v22 = vadd.f32 %v1426_v38, %v1338_v4 }
 0x195   : > { %v1512_v54 = vmul.f32 %v2754_v17, %v1427_v22  ;;  %vm1477_vm5 = vcmp.ge.f32.partialorder %v1427_v22, 0.0 }
 0x196   : > { %v1250_v5 = vpop.f32.mrf.mxu2 }
 0x197   : > { %v1251_v8 = vadd.f32 %v1250_v5, %v1162_v20  ;;  %v1339_v9 = vpop.f32.mrf.mxu3  ;;  %v1544_v27 = vsel %vm1477_vm5, %v1427_v22, %v1512_v54 }
 0x198   : > { %v1164_v11 = vpop.f32.mrf.mxu1 }
 0x199   : > { %v1340_v12 = vadd.f32 %v1339_v9, %v1251_v8  ;;  %v1165_v23 = vadd.f32 %v1164_v11, %v2720_v15 }
 0x19a   : > { %v1431_v58 = vpop.f32.mrf.mxu0 }
 0x19b   : > { %v1429_v24 = vadd.f32 %v1428_v3, %v1340_v12 }
 0x19d   : > { %vm1478_vm6 = vcmp.ge.f32.partialorder %v1429_v24, 0.0  ;;  %v1513_v25 = vmul.f32 %v2754_v17, %v1429_v24 }
 0x19e   : > { %v1253_v26 = vpop.f32.mrf.mxu2 }
 0x19f   : > { %v1545_v6 = vsel %vm1478_vm6, %v1429_v24, %v1513_v25  ;;  %v1254_v28 = vadd.f32 %v1253_v26, %v1165_v23  ;;  %v1342_v29 = vpop.f32.mrf.mxu3 }
 0x1a0   : > { %v2336_v32 = vpack.c.bf16 %v1545_v6, %v1544_v27  ;;  %v1166_v18 = vpop.f32.mrf.mxu1 }
 0x1a1   : > { %v1343_v33 = vadd.f32 %v1342_v29, %v1254_v28  ;;  %v1167_v34 = vadd.f32 %v1166_v18, %v2736_v35 }
 0x1a2   : > { %v1433_v61 = vpop.f32.mrf.mxu0  ;;  %2372 = vst [vmem:[%s2764_s20 + $0x50] sm:$0xff] %v2336_v32  }
 0x1a3   : > { %v1432_v43 = vadd.f32 %v1431_v58, %v1343_v33 }
 0x1a5   : > { %v1514_v60 = vmul.f32 %v2754_v17, %v1432_v43  ;;  %vm1479_vm7 = vcmp.ge.f32.partialorder %v1432_v43, 0.0 }
 0x1a6   : > { %v1255_v42 = vpop.f32.mrf.mxu2 }
 0x1a7   : > { %v1256_v41 = vadd.f32 %v1255_v42, %v1167_v34  ;;  %v1344_v30 = vpop.f32.mrf.mxu3  ;;  %v1546_v48 = vsel %vm1479_vm7, %v1432_v43, %v1514_v60 }
 0x1a8   : > { %v1169_v21 = vpop.f32.mrf.mxu1 }
 0x1a9   : > { %v1345_v44 = vadd.f32 %v1344_v30, %v1256_v41  ;;  %v1170_v47 = vadd.f32 %v1169_v21, %v2647_v19 }
 0x1aa   : > { %v1436_v15 = vpop.f32.mrf.mxu0 }
 0x1ab   : > { %v1434_v45 = vadd.f32 %v1433_v61, %v1345_v44 }
 0x1ad   : > { %vm1480_vm8 = vcmp.ge.f32.partialorder %v1434_v45, 0.0  ;;  %v1515_v46 = vmul.f32 %v2754_v17, %v1434_v45 }
 0x1ae   : > { %v1258_v14 = vpop.f32.mrf.mxu2 }
 0x1af   : > { %v1547_v35 = vsel %vm1480_vm8, %v1434_v45, %v1515_v46  ;;  %v1259_v49 = vadd.f32 %v1258_v14, %v1170_v47  ;;  %v1347_v52 = vpop.f32.mrf.mxu3 }
 0x1b0   : > { %v2341_v53 = vpack.c.bf16 %v1547_v35, %v1546_v48  ;;  %v1171_v55 = vpop.f32.mrf.mxu1 }
 0x1b1   : > { %v1348_v38 = vadd.f32 %v1347_v52, %v1259_v49  ;;  %v1172_v13 = vadd.f32 %v1171_v55, %v2663_v31 }
 0x1b2   : > { %v1438_v56 = vpop.f32.mrf.mxu0  ;;  %2373 = vst [vmem:[%s2764_s20 + $0x58] sm:$0xff] %v2341_v53  }
 0x1b3   : > { %v1437_v37 = vadd.f32 %v1436_v15, %v1348_v38 }
 0x1b5   : > { %v1516_v57 = vmul.f32 %v2754_v17, %v1437_v37  ;;  %vm1481_vm9 = vcmp.ge.f32.partialorder %v1437_v37, 0.0 }
 0x1b6   : > { %v1260_v40 = vpop.f32.mrf.mxu2 }
 0x1b7   : > { %v1261_v62 = vadd.f32 %v1260_v40, %v1172_v13  ;;  %v1349_v63 = vpop.f32.mrf.mxu3  ;;  %v1548_v4 = vsel %vm1481_vm9, %v1437_v37, %v1516_v57 }
 0x1b8   : > { %v1174_v0 = vpop.f32.mrf.mxu1 }
 0x1b9   : > { %v1350_v50 = vadd.f32 %v1349_v63, %v1261_v62  ;;  %v1175_v2 = vadd.f32 %v1174_v0, %v2672_v39 }
 0x1ba   : > { %v1441_v19 = vpop.f32.mrf.mxu0 }
 0x1bb   : > { %v1439_v10 = vadd.f32 %v1438_v56, %v1350_v50 }
 0x1bd   : > { %vm1482_vm10 = vcmp.ge.f32.partialorder %v1439_v10, 0.0  ;;  %v1517_v1 = vmul.f32 %v2754_v17, %v1439_v10 }
 0x1be   : > { %v1263_v3 = vpop.f32.mrf.mxu2 }
 0x1bf   : > { %v1549_v31 = vsel %vm1482_vm10, %v1439_v10, %v1517_v1  ;;  %v1264_v20 = vadd.f32 %v1263_v3, %v1175_v2  ;;  %v1352_v5 = vpop.f32.mrf.mxu3 }
 0x1c0   : > { %v2346_v22 = vpack.c.bf16 %v1549_v31, %v1548_v4  ;;  %v1176_v8 = vpop.f32.mrf.mxu1 }
 0x1c1   : > { %v1353_v11 = vadd.f32 %v1352_v5, %v1264_v20  ;;  %v1177_v12 = vadd.f32 %v1176_v8, %v2688_v51 }
 0x1c2   : > { %2374 = vst [vmem:[%s2764_s20 + $0x60] sm:$0xff] %v2346_v22   ;;  %v1443_v9 = vpop.f32.mrf.mxu0 }
 0x1c3   : > { %v1442_v54 = vadd.f32 %v1441_v19, %v1353_v11 }
 0x1c5   : > { %v1518_v39 = vmul.f32 %v2754_v17, %v1442_v54  ;;  %vm1483_vm11 = vcmp.ge.f32.partialorder %v1442_v54, 0.0 }
 0x1c6   : > { %v1265_v58 = vpop.f32.mrf.mxu2 }
 0x1c7   : > { %v1266_v24 = vadd.f32 %v1265_v58, %v1177_v12  ;;  %v1354_v25 = vpop.f32.mrf.mxu3  ;;  %v1550_v18 = vsel %vm1483_vm11, %v1442_v54, %v1518_v39 }
 0x1c8   : > { %v1179_v23 = vpop.f32.mrf.mxu1 }
 0x1c9   : > { %v1355_v26 = vadd.f32 %v1354_v25, %v1266_v24  ;;  %v1180_v29 = vadd.f32 %v1179_v23, %v2697_v59 }
 0x1ca   : > { %v1446_v6 = vpop.f32.mrf.mxu0 }
 0x1cb   : > { %v1444_v27 = vadd.f32 %v1443_v9, %v1355_v26 }
 0x1cd   : > { %vm1484_vm12 = vcmp.ge.f32.partialorder %v1444_v27, 0.0  ;;  %v1519_v28 = vmul.f32 %v2754_v17, %v1444_v27 }
 0x1ce   : > { %v1268_v32 = vpop.f32.mrf.mxu2 }
 0x1cf   : > { %v1551_v51 = vsel %vm1484_vm12, %v1444_v27, %v1519_v28  ;;  %v1269_v61 = vadd.f32 %v1268_v32, %v1180_v29  ;;  %v1357_v33 = vpop.f32.mrf.mxu3 }
 0x1d0   : > { %v2351_v34 = vpack.c.bf16 %v1551_v51, %v1550_v18  ;;  %v1181_v42 = vpop.f32.mrf.mxu1 }
 0x1d1   : > { %v1358_v43 = vadd.f32 %v1357_v33, %v1269_v61  ;;  %v1182_v41 = vadd.f32 %v1181_v42, %v2713_v7 }
 0x1d2   : > { %2375 = vst [vmem:[%s2764_s20 + $0x68] sm:$0xff] %v2351_v34   ;;  %v1448_v30 = vpop.f32.mrf.mxu0 }
 0x1d3   : > { %v1447_v44 = vadd.f32 %v1446_v6, %v1358_v43 }
 0x1d5   : > { %v1520_v59 = vmul.f32 %v2754_v17, %v1447_v44  ;;  %vm1485_vm13 = vcmp.ge.f32.partialorder %v1447_v44, 0.0 }
 0x1d6   : > { %v1270_v21 = vpop.f32.mrf.mxu2 }
 0x1d7   : > { %v1271_v15 = vadd.f32 %v1270_v21, %v1182_v41  ;;  %v1359_v60 = vpop.f32.mrf.mxu3  ;;  %v1552_v49 = vsel %vm1485_vm13, %v1447_v44, %v1520_v59 }
 0x1d8   : > { %v1184_v45 = vpop.f32.mrf.mxu1 }
 0x1d9   : > { %v1360_v46 = vadd.f32 %v1359_v60, %v1271_v15  ;;  %v1185_v48 = vadd.f32 %v1184_v45, %v2722_v16 }
 0x1da   : > { %v1451_v56 = vpop.f32.mrf.mxu0 }
 0x1db   : > { %v1449_v47 = vadd.f32 %v1448_v30, %v1360_v46 }
 0x1dd   : > { %vm1486_vm14 = vcmp.ge.f32.partialorder %v1449_v47, 0.0  ;;  %v1521_v14 = vmul.f32 %v2754_v17, %v1449_v47 }
 0x1de   : > { %v1273_v35 = vpop.f32.mrf.mxu2 }
 0x1df   : > { %v1553_v7 = vsel %vm1486_vm14, %v1449_v47, %v1521_v14  ;;  %v1274_v52 = vadd.f32 %v1273_v35, %v1185_v48  ;;  %v1362_v53 = vpop.f32.mrf.mxu3 }
 0x1e0   : > { %v2356_v55 = vpack.c.bf16 %v1553_v7, %v1552_v49  ;;  %v1186_v38 = vpop.f32.mrf.mxu1 }
 0x1e1   : > { %v1363_v13 = vadd.f32 %v1362_v53, %v1274_v52  ;;  %v1187_v40 = vadd.f32 %v1186_v38, %v2738_v36 }
 0x1e2   : > { %2376 = vst [vmem:[%s2764_s20 + $0x70] sm:$0xff] %v2356_v55   ;;  %v1453_v19 = vpop.f32.mrf.mxu0 }
 0x1e3   : > { %v1452_v62 = vadd.f32 %v1451_v56, %v1363_v13 }
 0x1e5   : > { %v1522_v16 = vmul.f32 %v2754_v17, %v1452_v62  ;;  %vm1487_vm15 = vcmp.ge.f32.partialorder %v1452_v62, 0.0 }
 0x1e6   : > { %v1275_v37 = vpop.f32.mrf.mxu2 }
 0x1e7   : > { %v1276_v63 = vadd.f32 %v1275_v37, %v1187_v40  ;;  %v1364_v0 = vpop.f32.mrf.mxu3  ;;  %v1554_v1 = vsel %vm1487_vm15, %v1452_v62, %v1522_v16 }
 0x1e9   : > { %v1365_v50 = vadd.f32 %v1364_v0, %v1276_v63 }
 0x1eb   : > { %v1454_v57 = vadd.f32 %v1453_v19, %v1365_v50 }
 0x1ed   : > { %vm1488_vm0 = vcmp.ge.f32.partialorder %v1454_v57, 0.0  ;;  %v1523_v10 = vmul.f32 %v2754_v17, %v1454_v57 }
 0x1ef   : > { %v1555_v2 = vsel %vm1488_vm0, %v1454_v57, %v1523_v10 }
 0x1f0   : > { %v2361_v3 = vpack.c.bf16 %v1555_v2, %v1554_v1 }
 0x1f2   : > { %2377 = vst [vmem:[%s2764_s20 + $0x78] sm:$0xff] %v2361_v3  }
 0x1f3 PF: > { %s13_s12 = sadd.s32 1, %s2418_s12  }
 0x1f4   : > { %p10_p4 = scmp.ge.s32.totalorder %s13_s12, 4  }
 0x1f6   :  { %12 = sbr.rel (!%p10_p4) target bundleno = 1 (0x1), region = 62 }

// kernel: bottleneck_ir_forward.3
= control target key start
LH: loop header
LB: loop body
LE: loop exit
PB: predicated region body
PF: predicated region fallthrough
CT: control target
= control target key end

     0   :  { %10 = vsyncpa [#allocation3], 0  ;;  %s2775_s0 = inlined_call_operand.vmem [shape: bf16[128,1152], index: 0, kind: input, shape index: {}]   ;;  %s2776_s1 = inlined_call_operand.vmem [shape: bf16[1152,128], index: 1, kind: input, shape index: {}]   ;;  %s2777_s2 = inlined_call_operand.vmem [shape: bf16[128,64], index: 2, kind: input, shape index: {}]   ;;  %s2778_s3 = inlined_call_operand.vmem [shape: bf16[64,128], index: 3, kind: input, shape index: {}]   ;;  %s2779_s4 = inlined_call_operand.vmem [shape: f32[1,128], index: 4, kind: input, shape index: {}]   ;;  %s2780_s5 = inlined_call_operand.hbm [shape: f32[128,128], index: 5, kind: output, shape index: {}]  }
   0x1   :  { %12 = vsyncpa [#allocation3 + $0x1], 0  ;;  %s2275_s18 = smov 0   ;;  %s2277_s19 = smov 0  }
   0x2   :  { %s2279_s20 = smov 0   ;;  %s2281_s21 = smov 0  }
   0x3 LB: > { %s2296_s22 = sadd.s32 4294967295, %s2241_s21   ;;  %s1525_s23 = sadd.s32 4294967294, %s2241_s21   ;;  %s2241_s21 = sphi %s2281_s21, %s2786_s21   ;;  %s2237_s20 = sphi %s2279_s20, %s2785_s20   ;;  %s2233_s19 = sphi %s2277_s19, %s2784_s19   ;;  %s2229_s18 = sphi %s2275_s18, %s2783_s18  }
   0x4   : > { %s2300_s24 = sadd.s32 1, %s2241_s21   ;;  %s140_s25 = sadd.s32 1, %s2237_s20 }
   0x5   : > { %s137_s26 = ssub.s32 %s2241_s21, %s2300_s24  ;;  %p150_p0 = scmp.ne.s32.totalorder %s2237_s20, %s2233_s19 }
   0x6   : > { %p138_p1 = scmp.eq.s32.totalorder %s137_s26, 0  ;;  %p151_p2 = scmp.eq.s32.totalorder %s2296_s22, 1 }
   0x7   : > { %p156_p3 = scmp.ne.s32.totalorder %s2233_s19, %s2229_s18  ;;  %p157_p4 = scmp.eq.s32.totalorder %s1525_s23, 1 }
   0x8   : > { %s2311_s27 = scalar_select %p138_p1, %s2237_s20, %s140_s25  }
   0x9   : > { %p2313_p5 = por %p151_p2, %p150_p0  ;;  %p2317_p6 = por %p157_p4, %p156_p3 }
   0xa   : > { %p1528_p7 = scmp.ge.s32.totalorder %s2241_s21, 1  ;;  %p203_p8 = scmp.lt.s32.totalorder %s2241_s21, 3 }
   0xc   : > { %p204_p9 = pnand %p1528_p7, %p203_p8 }
   0xd   : > { %s1530_s7 = sshll.u32 (!%p204_p9), %s2296_s22, 3  ;;  %s2123_s30 = sshll.u32 (!%p204_p9), %s2296_s22, 6 }
   0xe   : > { %207 = sbr.rel (%p204_p9) target bundleno = 349 (0x15d), region = 40  ;;  %p238_p10 = scmp.lt.s32.totalorder (!%p204_p9), %s1530_s7, 15 }
  0x13   : > { %v2050_v0 = vld [vmem:[%s2776_s1 + $0x38] sm:$0xff]  ;;  %v2049_v2 = vld [vmem:[%s2776_s1 + $0x30] sm:$0xff]  ;;  %s2788_s7 = smov (!%p238_p10, %s1530_s7), 15  ;;  %v2048_v4 = vld [vmem:[%s2776_s1 + $0x28] sm:$0xff]  ;;  %vm496_vm0 = vcmask 523264  }
  0x14   : > { %v2122_v1 = vld [vmem:[%s2778_s3 + $0x18] sm:$0xff]  ;;  %2128 = vmatpush.bf16.msra.mxu2 %v2050_v0  ;;  %1154 = vmatpush.bf16.msra.mxu1 %v2050_v0  ;;  %v2121_v3 = vld [vmem:[%s2778_s3 + $0x10] sm:$0xff]  ;;  %v2120_v5 = vld [vmem:[%s2778_s3 + $0x8] sm:$0xff]  ;;  %s1533_s23 = sshll.u32 %s2788_s7, 2  ;;  %s2136_s8 = smul.u32 36, %s2788_s7 }
  0x15   : > { %2124 = vmatpush.bf16.msra.mxu3 %v2122_v1  ;;  %513 = vmatpush.bf16.msra.mxu0 %v2122_v1  ;;  %v2047_v6 = vld [vmem:[%s2776_s1 + $0x20] sm:$0xff]  ;;  %s2354_s10 = scalar_lea.vmem %s2777_s2, %s1533_s23  ;;  %v2066_v8 = vld [vmem:[%s2776_s1 + $0xb8] sm:$0xff]  ;;  %v2065_v13 = vld [vmem:[%s2776_s1 + $0xb0] sm:$0xff]  ;;  %s2199_s7 = scalar_lea.hbm %s2780_s5, 128 }
  0x16   : > { %v2119_v7 = vld [vmem:[%s2778_s3] sm:$0xff]  ;;  %v2074_v9 = vld [vmem:[%s2776_s1 + $0xf8] sm:$0xff]  ;;  %v2117_v11 = vld [vmem:[%s2354_s10 + $0x10] sm:$0xff]  ;;  %s2391_s17 = scalar_lea.vmem %s2775_s0, %s2136_s8  ;;  %s1447_s8 = scalar_lea.hbm %s2780_s5, %s2123_s30 }
  0x17   : > { %v2046_v10 = vld [vmem:[%s2776_s1 + $0x18] sm:$0xff]  ;;  %v2115_v12 = vld [vmem:[%s2354_s10] sm:$0xff]  ;;  %v2073_v14 = vld [vmem:[%s2776_s1 + $0xf0] sm:$0xff]  ;;  %s1450_s12 = sshll.u32 %s1447_s8, 4  ;;  %s1451_s12 = int_to_ptr.hbm [resolvable:$true] %s1450_s12 }
  0x18   : > { %2129 = vmatpush.bf16.msra.mxu2 %v2049_v2  ;;  %1155 = vmatpush.bf16.msra.mxu1 %v2049_v2  ;;  %v2045_v15 = vld [vmem:[%s2776_s1 + $0x10] sm:$0xff]  ;;  %v2064_v16 = vld [vmem:[%s2776_s1 + $0xa8] sm:$0xff]  ;;  %v2063_v19 = vld [vmem:[%s2776_s1 + $0xa0] sm:$0xff]  ;;  %s2193_s13 = sshra.s32 %s1451_s12, 4  ;;  %s2194_s13 = int_to_ptr.hbm [resolvable:$true] %s2193_s13 }
  0x19   : > { %2125 = vmatpush.bf16.msra.mxu3 %v2121_v3  ;;  %514 = vmatpush.bf16.msra.mxu0 %v2121_v3  ;;  %v2072_v17 = vld [vmem:[%s2776_s1 + $0xe8] sm:$0xff]  ;;  %v2071_v20 = vld [vmem:[%s2776_s1 + $0xe0] sm:$0xff]  ;;  %v1644_v22 = vld [vmem:[%s2391_s17 + $0x90] sm:$0xf]  ;;  %p2200_p0 = scmp.lt.s32.totalorder %s2194_s13, %s2780_s5 }
  0x1a   : > { %v2044_v18 = vld [vmem:[%s2776_s1 + $0x8] sm:$0xff]  ;;  %v2043_v21 = vld [vmem:[%s2776_s1] sm:$0xff]  ;;  %v2029_v23 = vld [vmem:[%s2391_s17 + $0xb0] sm:$0xf0] }
  0x1b   : > { %v1572_v24 = vld [vmem:[%s2391_s17] sm:$0xf]  ;;  %v2011_v25 = vld [vmem:[%s2391_s17 + $0x20] sm:$0xf0]  ;;  %v2058_v26 = vld [vmem:[%s2776_s1 + $0x78] sm:$0xff]  ;;  %v1645_v30 = vor.u32 %v2029_v23, %v1644_v22 }
  0x1c   : > { %2130 = vmatpush.bf16.msra.mxu2 %v2048_v4  ;;  %1156 = vmatpush.bf16.msra.mxu1 %v2048_v4  ;;  %v2082_v27 = vld [vmem:[%s2776_s1 + $0x138] sm:$0xff]  ;;  %v1573_v31 = vor.u32 %v2011_v25, %v1572_v24  ;;  %v2057_v32 = vld [vmem:[%s2776_s1 + $0x70] sm:$0xff]  ;;  %v2116_v35 = vld [vmem:[%s2354_s10 + $0x8] sm:$0xff] }
  0x1d   : > { %2126 = vmatpush.bf16.msra.mxu3 %v2120_v5  ;;  %515 = vmatpush.bf16.msra.mxu0 %v2120_v5  ;;  %v2062_v28 = vld [vmem:[%s2776_s1 + $0x98] sm:$0xff]  ;;  %v2081_v33 = vld [vmem:[%s2776_s1 + $0x130] sm:$0xff]  ;;  %v2056_v38 = vld [vmem:[%s2776_s1 + $0x68] sm:$0xff] }
  0x1e   : > { %v2070_v29 = vld [vmem:[%s2776_s1 + $0xd8] sm:$0xff]  ;;  %v2061_v36 = vld [vmem:[%s2776_s1 + $0x90] sm:$0xff]  ;;  %v2080_v39 = vld [vmem:[%s2776_s1 + $0x128] sm:$0xff] }
  0x1f   : > { %v2118_v34 = vld [vmem:[%s2354_s10 + $0x18] sm:$0xff]  ;;  %v2069_v37 = vld [vmem:[%s2776_s1 + $0xd0] sm:$0xff]  ;;  %v2060_v40 = vld [vmem:[%s2776_s1 + $0x88] sm:$0xff]  ;;  %s2195_s10 = scalar_lea.hbm %s2194_s13, 64 }
  0x20   : > { %2131 = vmatpush.bf16.msra.mxu2 %v2047_v6  ;;  %1157 = vmatpush.bf16.msra.mxu1 %v2047_v6  ;;  %v2068_v41 = vld [vmem:[%s2776_s1 + $0xc8] sm:$0xff]  ;;  %v2055_v42 = vld [vmem:[%s2776_s1 + $0x60] sm:$0xff]  ;;  %v1680_v44 = vld [vmem:[%s2391_s17 + $0xd8] sm:$0xf]  ;;  %p2196_p11 = scmp.ne.s32.totalorder %s2194_s13, %s2195_s10  ;;  %p2201_p1 = scmp.lt.s32.totalorder %s2199_s7, %s2195_s10 }
  0x21   : > { %2127 = vmatpush.bf16.msra.mxu3 %v2119_v7  ;;  %516 = vmatpush.bf16.msra.mxu0 %v2119_v7  ;;  %v2079_v43 = vld [vmem:[%s2776_s1 + $0x120] sm:$0xff]  ;;  %v2038_v45 = vld [vmem:[%s2391_s17 + $0xf8] sm:$0xf0]  ;;  %v1608_v46 = vld [vmem:[%s2391_s17 + $0x48] sm:$0xf] }
  0x22   : > { %v2059_v47 = vld [vmem:[%s2776_s1 + $0x80] sm:$0xff]  ;;  %v2020_v49 = vld [vmem:[%s2391_s17 + $0x68] sm:$0xf0]  ;;  %v2098_v50 = vld [vmem:[%s2776_s1 + $0x1b8] sm:$0xff]  ;;  %v1681_v55 = vor.u32 %v2038_v45, %v1680_v44  ;;  %p2197_p12 = pnand %p2196_p11, %p2313_p5  ;;  %p2202_p2 = por %p2201_p1, %p2200_p0 }
  0x23   : > { %v2067_v48 = vld [vmem:[%s2776_s1 + $0xc0] sm:$0xff]  ;;  %v2106_v51 = vld [vmem:[%s2776_s1 + $0x1f8] sm:$0xff]  ;;  %v1580_v54 = vld [vmem:[%s2391_s17 + $0x8] sm:$0xf]  ;;  %v1609_v56 = vor.u32 %v2020_v49, %v1608_v46 }
  0x24   : > { %2132 = vmatpush.bf16.msra.mxu2 %v2046_v10  ;;  %1158 = vmatpush.bf16.msra.mxu1 %v2046_v10  ;;  %v2054_v52 = vld [vmem:[%s2776_s1 + $0x58] sm:$0xff]  ;;  %v2012_v57 = vld [vmem:[%s2391_s17 + $0x28] sm:$0xf0]  ;;  %v1582_v59 = vld [vmem:[%s2391_s17 + $0x2c] sm:$0xf0]  ;;  %p2198_p13 = pneg %p2197_p12 }
  0x25   : > { %1212 = vmatpush.bf16.msrb.mxu3 %v2066_v8  ;;  %1241 = vmatpush.bf16.msrb.mxu0 %v2074_v9  ;;  %v2078_v53 = vld [vmem:[%s2776_s1 + $0x118] sm:$0xff]  ;;  %v2008_v58 = vld [vmem:[%s2391_s17 + $0xc] sm:$0xf]  ;;  %v2097_v60 = vld [vmem:[%s2776_s1 + $0x1b0] sm:$0xff]  ;;  %v1581_v63 = vor.u32 %v2012_v57, %v1580_v54 }
  0x26   : > { %1568 = vmatmul.msk.bf16.vlgmr.msra.gmra.mxu3 %vm496_vm0, %v2117_v11  ;;  %1566 = vmatmul.msk.bf16.vlgmr.msra.gmra.mxu0 %vm496_vm0, %v2115_v12  ;;  %v2053_v61 = vld [vmem:[%s2776_s1 + $0x50] sm:$0xff]  ;;  %v1585_v0 = vor.u32 %v2008_v58, %v1582_v59  ;;  %v2096_v2 = vld [vmem:[%s2776_s1 + $0x1a8] sm:$0xff]  ;;  %v2095_v6 = vld [vmem:[%s2776_s1 + $0x1a0] sm:$0xff]  ;;  %p2203_p3 = pnand %p2202_p2, %p2198_p13 }
  0x27   : > { %v2077_v62 = vld [vmem:[%s2776_s1 + $0x110] sm:$0xff]  ;;  %v2052_v3 = vld [vmem:[%s2776_s1 + $0x48] sm:$0xff]  ;;  %v2051_v7 = vld [vmem:[%s2776_s1 + $0x40] sm:$0xff] }
  0x28   : > { %2133 = vmatpush.bf16.msra.mxu2 %v2045_v15  ;;  %1159 = vmatpush.bf16.msra.mxu1 %v2045_v15  ;;  %v2105_v1 = vld [vmem:[%s2776_s1 + $0x1f0] sm:$0xff]  ;;  %v2076_v4 = vld [vmem:[%s2776_s1 + $0x108] sm:$0xff]  ;;  %v2075_v8 = vld [vmem:[%s2776_s1 + $0x100] sm:$0xff] }
  0x29   : > { %1213 = vmatpush.bf16.msrb.mxu3 %v2065_v13  ;;  %1242 = vmatpush.bf16.msrb.mxu0 %v2073_v14  ;;  %v2104_v5 = vld [vmem:[%s2776_s1 + $0x1e8] sm:$0xff]  ;;  %v2090_v9 = vld [vmem:[%s2776_s1 + $0x178] sm:$0xff]  ;;  %v2007_v11 = vld [vmem:[%s2391_s17 + $0x4] sm:$0xf] }
  0x2a   : > { %v2114_v10 = vld [vmem:[%s2776_s1 + $0x238] sm:$0xff]  ;;  %v1574_v12 = vld [vmem:[%s2391_s17 + $0x24] sm:$0xf0]  ;;  %v1588_v13 = vld [vmem:[%s2391_s17 + $0x10] sm:$0xf] }
  0x2b   : > { %v2013_v14 = vld [vmem:[%s2391_s17 + $0x30] sm:$0xf0]  ;;  %v1618_v22 = vld [vmem:[%s2391_s17 + $0x74] sm:$0xf0]  ;;  %v2088_v24 = vld [vmem:[%s2776_s1 + $0x168] sm:$0xff] }
  0x2c   : > { %2134 = vmatpush.bf16.msra.mxu2 %v2044_v18  ;;  %1160 = vmatpush.bf16.msra.mxu1 %v2044_v18  ;;  %v2089_v15 = vld [vmem:[%s2776_s1 + $0x170] sm:$0xff]  ;;  %v1589_v18 = vor.u32 %v2013_v14, %v1588_v13  ;;  %v2026_v44 = vld [vmem:[%s2391_s17 + $0x9c] sm:$0xf]  ;;  %v1654_v45 = vld [vmem:[%s2391_s17 + $0xbc] sm:$0xf0] }
  0x2d   : > { %1214 = vmatpush.bf16.msrb.mxu3 %v2064_v16  ;;  %1243 = vmatpush.bf16.msrb.mxu0 %v2072_v17  ;;  %v2113_v16 = vld [vmem:[%s2776_s1 + $0x230] sm:$0xff]  ;;  %v1577_v17 = vor.u32 %v2007_v11, %v1574_v12  ;;  %v2092_v49 = vld [vmem:[%s2776_s1 + $0x188] sm:$0xff]  ;;  %v1646_v58 = vld [vmem:[%s2391_s17 + $0xb4] sm:$0xf0] }
  0x2e   : > { %v2100_v54 = vld [vmem:[%s2776_s1 + $0x1c8] sm:$0xff]  ;;  %v2025_v57 = vld [vmem:[%s2391_s17 + $0x94] sm:$0xf]  ;;  %v1660_v59 = vld [vmem:[%s2391_s17 + $0xa0] sm:$0xf] }
  0x2f   : > { %v1596_v12 = vld [vmem:[%s2391_s17 + $0x18] sm:$0xf]  ;;  %v2014_v13 = vld [vmem:[%s2391_s17 + $0x38] sm:$0xf0] }
  0x30   : > { %2135 = vmatpush.bf16.msra.mxu2 %v2043_v21  ;;  %1161 = vmatpush.bf16.msra.mxu1 %v2043_v21  ;;  %v2017_v21 = vld [vmem:[%s2391_s17 + $0x54] sm:$0xf]  ;;  %v2010_v14 = vld [vmem:[%s2391_s17 + $0x1c] sm:$0xf] }
  0x31   : > { %1215 = vmatpush.bf16.msrb.mxu3 %v2063_v19  ;;  %1244 = vmatpush.bf16.msrb.mxu0 %v2071_v20  ;;  %v1616_v19 = vld [vmem:[%s2391_s17 + $0x50] sm:$0xf]  ;;  %v2021_v20 = vld [vmem:[%s2391_s17 + $0x70] sm:$0xf0]  ;;  %v1621_v25 = vor.u32 %v2017_v21, %v1618_v22  ;;  %v2015_v21 = vld [vmem:[%s2391_s17 + $0x40] sm:$0xf0] }
  0x32   : > { %v1617_v23 = vor.u32 %v2021_v20, %v1616_v19  ;;  %v1590_v19 = vld [vmem:[%s2391_s17 + $0x34] sm:$0xf0]  ;;  %v1604_v20 = vld [vmem:[%s2391_s17 + $0x20] sm:$0xf] }
  0x33   : > { %1172 = vmatmul.bf16.vlgmr.msra.gmra.mxu2 %v1645_v30  ;;  %1162 = vmatmul.bf16.vlgmr.msra.gmra.mxu1 %v1573_v31  ;;  %v2093_v30 = vld [vmem:[%s2776_s1 + $0x190] sm:$0xff]  ;;  %v2102_v31 = vld [vmem:[%s2776_s1 + $0x1d8] sm:$0xff] }
  0x34   : > { %1183 = vmatpush.bf16.msrb.mxu2 %v2058_v26  ;;  %1270 = vmatpush.bf16.msrb.mxu1 %v2082_v27  ;;  %v2112_v26 = vld [vmem:[%s2776_s1 + $0x228] sm:$0xff]  ;;  %v2094_v27 = vld [vmem:[%s2776_s1 + $0x198] sm:$0xff] }
  0x35   : > { %1216 = vmatpush.bf16.msrb.mxu3 %v2062_v28  ;;  %1245 = vmatpush.bf16.msrb.mxu0 %v2070_v29  ;;  %v2103_v28 = vld [vmem:[%s2776_s1 + $0x1e0] sm:$0xff] }
  0x36   : > { %1569 = vmatmul.msk.bf16.gmra.mxu3 %vm496_vm0, %v2118_v34  ;;  %1567 = vmatmul.msk.bf16.gmra.mxu0 %vm496_vm0, %v2116_v35  ;;  %v2087_v29 = vld [vmem:[%s2776_s1 + $0x160] sm:$0xff]  ;;  %v2016_v34 = vld [vmem:[%s2391_s17 + $0x4c] sm:$0xf]  ;;  %v2110_v35 = vld [vmem:[%s2776_s1 + $0x218] sm:$0xff] }
  0x38   : > { %1184 = vmatpush.bf16.msrb.mxu2 %v2057_v32  ;;  %1271 = vmatpush.bf16.msrb.mxu1 %v2081_v33  ;;  %v2111_v32 = vld [vmem:[%s2776_s1 + $0x220] sm:$0xff]  ;;  %v2086_v33 = vld [vmem:[%s2776_s1 + $0x158] sm:$0xff] }
  0x39   : > { %1217 = vmatpush.bf16.msrb.mxu3 %v2061_v36  ;;  %1246 = vmatpush.bf16.msrb.mxu0 %v2069_v37  ;;  %v1610_v36 = vld [vmem:[%s2391_s17 + $0x6c] sm:$0xf0]  ;;  %v1624_v37 = vld [vmem:[%s2391_s17 + $0x58] sm:$0xf] }
  0x3c   : > { %1185 = vmatpush.bf16.msrb.mxu2 %v2056_v38  ;;  %1272 = vmatpush.bf16.msrb.mxu1 %v2080_v39  ;;  %v2022_v38 = vld [vmem:[%s2391_s17 + $0x78] sm:$0xf0]  ;;  %v2085_v39 = vld [vmem:[%s2776_s1 + $0x150] sm:$0xff] }
  0x3d   : > { %1218 = vmatpush.bf16.msrb.mxu3 %v2060_v40  ;;  %1247 = vmatpush.bf16.msrb.mxu0 %v2068_v41  ;;  %v1613_v40 = vor.u32 %v2016_v34, %v1610_v36  ;;  %v1625_v41 = vor.u32 %v2022_v38, %v1624_v37  ;;  %v1668_v36 = vld [vmem:[%s2391_s17 + $0xa8] sm:$0xf]  ;;  %v2032_v37 = vld [vmem:[%s2391_s17 + $0xc8] sm:$0xf0] }
  0x3e   : > { %v2028_v38 = vld [vmem:[%s2391_s17 + $0xac] sm:$0xf] }
  0x40   : > { %1186 = vmatpush.bf16.msrb.mxu2 %v2055_v42  ;;  %1273 = vmatpush.bf16.msrb.mxu1 %v2079_v43  ;;  %v1652_v42 = vld [vmem:[%s2391_s17 + $0x98] sm:$0xf]  ;;  %v2030_v43 = vld [vmem:[%s2391_s17 + $0xb8] sm:$0xf0] }
  0x41   : > { %1219 = vmatpush.bf16.msrb.mxu3 %v2059_v47  ;;  %1248 = vmatpush.bf16.msrb.mxu0 %v2067_v48  ;;  %v1653_v46 = vor.u32 %v2030_v43, %v1652_v42  ;;  %v1657_v47 = vor.u32 %v2026_v44, %v1654_v45  ;;  %v2084_v48 = vld [vmem:[%s2776_s1 + $0x148] sm:$0xff]  ;;  %v2027_v45 = vld [vmem:[%s2391_s17 + $0xa4] sm:$0xf] }
  0x43   : > { %1177 = vmatmul.bf16.gmra.mxu2 %v1681_v55  ;;  %1167 = vmatmul.bf16.gmra.mxu1 %v1609_v56  ;;  %v2108_v55 = vld [vmem:[%s2776_s1 + $0x208] sm:$0xff]  ;;  %v2099_v56 = vld [vmem:[%s2776_s1 + $0x1c0] sm:$0xff] }
  0x44   : > { %1187 = vmatpush.bf16.msrb.mxu2 %v2054_v52  ;;  %1274 = vmatpush.bf16.msrb.mxu1 %v2078_v53  ;;  %v2091_v52 = vld [vmem:[%s2776_s1 + $0x180] sm:$0xff] }
  0x45   : > { %1328 = vmatpush.bf16.msra.mxu3 %v2098_v50  ;;  %1357 = vmatpush.bf16.msra.mxu0 %v2106_v51  ;;  %v2101_v50 = vld [vmem:[%s2776_s1 + $0x1d0] sm:$0xff]  ;;  %v2083_v53 = vld [vmem:[%s2776_s1 + $0x140] sm:$0xff] }
  0x46   : > { %1220 = vmatmul.bf16.vlgmr.msrb.gmra.mxu3 %v1581_v63  ;;  %1249 = vmatmul.bf16.vlgmr.msrb.gmra.mxu0 %v1585_v0  ;;  %v2109_v51 = vld [vmem:[%s2776_s1 + $0x210] sm:$0xff]  ;;  %v1688_v63 = vld [vmem:[%s2391_s17 + $0xe0] sm:$0xf]  ;;  %v2039_v0 = vld [vmem:[%s2391_s17 + $0x100] sm:$0xf0] }
  0x48   : > { %1188 = vmatpush.bf16.msrb.mxu2 %v2053_v61  ;;  %1275 = vmatpush.bf16.msrb.mxu1 %v2077_v62  ;;  %v1649_v61 = vor.u32 %v2025_v57, %v1646_v58 }
  0x49   : > { %1329 = vmatpush.bf16.msra.mxu3 %v2097_v60  ;;  %1358 = vmatpush.bf16.msra.mxu0 %v2105_v1  ;;  %v2031_v60 = vld [vmem:[%s2391_s17 + $0xc0] sm:$0xf0] }
  0x4a   : > { %v1661_v62 = vor.u32 %v2031_v60, %v1660_v59  ;;  %v2035_v1 = vld [vmem:[%s2391_s17 + $0xe4] sm:$0xf] }
  0x4c   : > { %1189 = vmatpush.bf16.msrb.mxu2 %v2052_v3  ;;  %1276 = vmatpush.bf16.msrb.mxu1 %v2076_v4  ;;  %v1689_v3 = vor.u32 %v2039_v0, %v1688_v63  ;;  %v2107_v4 = vld [vmem:[%s2776_s1 + $0x200] sm:$0xff] }
  0x4d   : > { %1330 = vmatpush.bf16.msra.mxu3 %v2096_v2  ;;  %1359 = vmatpush.bf16.msra.mxu0 %v2104_v5  ;;  %v1690_v2 = vld [vmem:[%s2391_s17 + $0x104] sm:$0xf0] }
  0x4e   : > { %v1693_v5 = vor.u32 %v2035_v1, %v1690_v2  ;;  %v2036_v2 = vld [vmem:[%s2391_s17 + $0xec] sm:$0xf] }
  0x50   : > { %1190 = vmatpush.bf16.msrb.mxu2 %v2051_v7  ;;  %1277 = vmatpush.bf16.msrb.mxu1 %v2075_v8  ;;  %v1682_v7 = vld [vmem:[%s2391_s17 + $0xfc] sm:$0xf0]  ;;  %v1696_v8 = vld [vmem:[%s2391_s17 + $0xe8] sm:$0xf] }
  0x51   : > { %1331 = vmatpush.bf16.msra.mxu3 %v2095_v6  ;;  %1360 = vmatpush.bf16.msra.mxu0 %v2103_v28  ;;  %v2034_v6 = vld [vmem:[%s2391_s17 + $0xdc] sm:$0xf] }
  0x53   : > { %1191 = vmatmul.bf16.vlgmr.msrb.gmra.mxu2 %v1577_v17  ;;  %1278 = vmatmul.bf16.vlgmr.msrb.gmra.mxu1 %v1589_v18  ;;  %v2009_v18 = vld [vmem:[%s2391_s17 + $0x14] sm:$0xf] }
  0x54   : > { %1299 = vmatpush.bf16.msra.mxu2 %v2090_v9  ;;  %1386 = vmatpush.bf16.msra.mxu1 %v2114_v10  ;;  %v2040_v9 = vld [vmem:[%s2391_s17 + $0x108] sm:$0xf0]  ;;  %v1685_v10 = vor.u32 %v2034_v6, %v1682_v7  ;;  %v1593_v22 = vor.u32 %v2009_v18, %v1590_v19  ;;  %v2042_v6 = vld [vmem:[%s2391_s17 + $0x118] sm:$0xf0] }
  0x55   : > { %1332 = vmatpush.bf16.msra.mxu3 %v2094_v27  ;;  %1361 = vmatpush.bf16.msra.mxu0 %v2102_v31  ;;  %v1697_v11 = vor.u32 %v2040_v9, %v1696_v8  ;;  %v1634_v27 = vld [vmem:[%s2391_s17 + $0x84] sm:$0xf0]  ;;  %v1626_v31 = vld [vmem:[%s2391_s17 + $0x7c] sm:$0xf0] }
  0x56   : > { %1225 = vmatmul.bf16.gmra.mxu3 %v1617_v23  ;;  %1254 = vmatmul.bf16.gmra.mxu0 %v1621_v25  ;;  %v1605_v23 = vor.u32 %v2015_v21, %v1604_v20  ;;  %v2023_v25 = vld [vmem:[%s2391_s17 + $0x80] sm:$0xf0] }
  0x58   : > { %1300 = vmatpush.bf16.msra.mxu2 %v2089_v15  ;;  %1387 = vmatpush.bf16.msra.mxu1 %v2113_v16  ;;  %v1598_v15 = vld [vmem:[%s2391_s17 + $0x3c] sm:$0xf0]  ;;  %v1597_v16 = vor.u32 %v2014_v13, %v1596_v12 }
  0x59   : > { %1333 = vmatpush.bf16.msra.mxu3 %v2093_v30  ;;  %1362 = vmatpush.bf16.msra.mxu0 %v2101_v50  ;;  %v1601_v17 = vor.u32 %v2010_v14, %v1598_v15  ;;  %v2018_v30 = vld [vmem:[%s2391_s17 + $0x5c] sm:$0xf] }
  0x5a   : > { %v1629_v34 = vor.u32 %v2018_v30, %v1626_v31 }
  0x5c   : > { %1301 = vmatpush.bf16.msra.mxu2 %v2088_v24  ;;  %1388 = vmatpush.bf16.msra.mxu1 %v2112_v26  ;;  %v1632_v24 = vld [vmem:[%s2391_s17 + $0x60] sm:$0xf]  ;;  %v2019_v26 = vld [vmem:[%s2391_s17 + $0x64] sm:$0xf] }
  0x5d   : > { %1334 = vmatpush.bf16.msra.mxu3 %v2092_v49  ;;  %1363 = vmatpush.bf16.msra.mxu0 %v2100_v54  ;;  %v1633_v28 = vor.u32 %v2023_v25, %v1632_v24 }
  0x60   : > { %1302 = vmatpush.bf16.msra.mxu2 %v2087_v29  ;;  %1389 = vmatpush.bf16.msra.mxu1 %v2111_v32  ;;  %v1637_v29 = vor.u32 %v2019_v26, %v1634_v27  ;;  %v1640_v32 = vld [vmem:[%s2391_s17 + $0x68] sm:$0xf] }
  0x61   : > { %1335 = vmatpush.bf16.msra.mxu3 %v2091_v52  ;;  %1364 = vmatpush.bf16.msra.mxu0 %v2099_v56  ;;  %v2041_v52 = vld [vmem:[%s2391_s17 + $0x110] sm:$0xf0]  ;;  %v1706_v56 = vld [vmem:[%s2391_s17 + $0x114] sm:$0xf0] }
  0x63   : > { %1196 = vmatmul.bf16.gmra.mxu2 %v1613_v40  ;;  %1283 = vmatmul.bf16.gmra.mxu1 %v1625_v41  ;;  %v1669_v40 = vor.u32 %v2032_v37, %v1668_v36 }
  0x64   : > { %1303 = vmatpush.bf16.msra.mxu2 %v2086_v33  ;;  %1390 = vmatpush.bf16.msra.mxu1 %v2110_v35  ;;  %v2024_v33 = vld [vmem:[%s2391_s17 + $0x88] sm:$0xf0] }
  0x65   : > { %v1641_v35 = vor.u32 %v2024_v33, %v1640_v32 }
  0x66   : > { %1230 = vmatmul.bf16.gmra.mxu3 %v1653_v46  ;;  %1259 = vmatmul.bf16.gmra.mxu0 %v1657_v47  ;;  %v1662_v46 = vld [vmem:[%s2391_s17 + $0xc4] sm:$0xf0]  ;;  %v1676_v47 = vld [vmem:[%s2391_s17 + $0xb0] sm:$0xf] }
  0x67   : > { %v1665_v49 = vor.u32 %v2027_v45, %v1662_v46 }
  0x68   : > { %1304 = vmatpush.bf16.msra.mxu2 %v2085_v39  ;;  %1391 = vmatpush.bf16.msra.mxu1 %v2109_v51  ;;  %v1670_v39 = vld [vmem:[%s2391_s17 + $0xcc] sm:$0xf0] }
  0x69   : > { %v1673_v42 = vor.u32 %v2028_v38, %v1670_v39  ;;  %v1704_v51 = vld [vmem:[%s2391_s17 + $0xf0] sm:$0xf] }
  0x6a   : > { %v1705_v58 = vor.u32 %v2041_v52, %v1704_v51 }
  0x6c   : > { %1305 = vmatpush.bf16.msra.mxu2 %v2084_v48  ;;  %1392 = vmatpush.bf16.msra.mxu1 %v2108_v55  ;;  %v2033_v48 = vld [vmem:[%s2391_s17 + $0xd0] sm:$0xf0] }
  0x6d   : > { %v1677_v50 = vor.u32 %v2033_v48, %v1676_v47  ;;  %v2037_v55 = vld [vmem:[%s2391_s17 + $0xf4] sm:$0xf] }
  0x6e   : > { %v1709_v60 = vor.u32 %v2037_v55, %v1706_v56 }
  0x70   : > { %1306 = vmatpush.bf16.msra.mxu2 %v2083_v53  ;;  %1393 = vmatpush.bf16.msra.mxu1 %v2107_v4  ;;  %v1698_v4 = vld [vmem:[%s2391_s17 + $0x10c] sm:$0xf0] }
  0x71   : > { %v1701_v9 = vor.u32 %v2036_v2, %v1698_v4 }
  0x73   : > { %1201 = vmatmul.bf16.gmra.mxu2 %v1649_v61  ;;  %1288 = vmatmul.bf16.gmra.mxu1 %v1661_v62 }
  0x76   : > { %1235 = vmatmul.bf16.gmra.mxu3 %v1689_v3  ;;  %1264 = vmatmul.bf16.gmra.mxu0 %v1693_v5  ;;  %v1712_v5 = vld [vmem:[%s2391_s17 + $0xf8] sm:$0xf]  ;;  %s234_s17 = sand.u32 1, %s2233_s19  }
  0x77   : > { %s1529_s16 = sshll.u32 %s234_s17, 6  ;;  %s1436_s22 = scalar_lea.sflag [#allocation3], %s234_s17 }
  0x78   : > { %s2703_s26 = scalar_lea.vmem [#allocation2], %s1529_s16 }
  0x79   : > { %s1448_s11 = sshll.u32 %s2703_s26, 4  ;;  %s1449_s11 = int_to_ptr.vmem [resolvable:$true] %s1448_s11 }
  0x83   : > { %1206 = vmatmul.bf16.gmra.mxu2 %v1685_v10  ;;  %1293 = vmatmul.bf16.gmra.mxu1 %v1697_v11  ;;  %v1713_v10 = vor.u32 %v2042_v6, %v1712_v5 }
  0x86   : > { %1336 = vmatmul.bf16.vlgmr.msra.gmra.mxu3 %v1597_v16  ;;  %1365 = vmatmul.bf16.vlgmr.msra.gmra.mxu0 %v1601_v17 }
  0x93   : > { %1307 = vmatmul.bf16.vlgmr.msra.gmra.mxu2 %v1593_v22  ;;  %1394 = vmatmul.bf16.vlgmr.msra.gmra.mxu1 %v1605_v23 }
  0x96   : > { %1341 = vmatmul.bf16.gmra.mxu3 %v1633_v28  ;;  %1370 = vmatmul.bf16.gmra.mxu0 %v1637_v29 }
  0xa3   : > { %v518_v41 = vpop.f32.mrf.mxu0  ;;  %1312 = vmatmul.bf16.gmra.mxu2 %v1629_v34  ;;  %1399 = vmatmul.bf16.gmra.mxu1 %v1641_v35 }
  0xa6   : > { %1346 = vmatmul.bf16.gmra.mxu3 %v1669_v40  ;;  %1375 = vmatmul.bf16.gmra.mxu0 %v1673_v42 }
  0xa9   : > { %v528_v43 = vpop.f32.mrf.mxu3 }
  0xab   : > { %v520_v44 = vpop.f32.mrf.mxu0 }
  0xb0   : > { %v1163_v53 = vpop.f32.mrf.mxu1 }
  0xb1   : > { %v530_v54 = vpop.f32.mrf.mxu3  ;;  %v2642_v57 = vadd.f32 %v1163_v53, %v518_v41 }
  0xb3   : > { %1317 = vmatmul.bf16.gmra.mxu2 %v1665_v49  ;;  %1404 = vmatmul.bf16.gmra.mxu1 %v1677_v50  ;;  %v523_v59 = vpop.f32.mrf.mxu0 }
  0xb6   : > { %v1173_v61 = vpop.f32.mrf.mxu2  ;;  %1351 = vmatmul.bf16.gmra.mxu3 %v1705_v58  ;;  %1380 = vmatmul.bf16.gmra.mxu0 %v1709_v60 }
  0xb7   : > { %v2644_v62 = vadd.f32 %v1173_v61, %v528_v43 }
  0xb8   : > { %v1165_v63 = vpop.f32.mrf.mxu1 }
  0xb9   : > { %v1166_v0 = vadd.f32 %v1165_v63, %v520_v44  ;;  %v533_v1 = vpop.f32.mrf.mxu3 }
  0xbb   : > { %v525_v3 = vpop.f32.mrf.mxu0 }
  0xbe   : > { %v1175_v7 = vpop.f32.mrf.mxu2 }
  0xbf   : > { %v2650_v8 = vadd.f32 %v1175_v7, %v530_v54 }
  0xc0   : > { %v1168_v11 = vpop.f32.mrf.mxu1 }
  0xc1   : > { %v1169_v12 = vadd.f32 %v1168_v11, %v523_v59  ;;  %v535_v13 = vpop.f32.mrf.mxu3 }
  0xc3   : > { %1322 = vmatmul.bf16.gmra.mxu2 %v1701_v9  ;;  %1409 = vmatmul.bf16.gmra.mxu1 %v1713_v10  ;;  %v1250_v14 = vpop.f32.mrf.mxu0  ;;  %v2699_v9 = vld [vmem:[%s2779_s4] ss:$0 sm:$0xff] }
  0xc6   : > { %v1178_v15 = vpop.f32.mrf.mxu2 }
  0xc7   : > { %v2652_v16 = vadd.f32 %v1178_v15, %v533_v1 }
  0xc8   : > { %v1170_v17 = vpop.f32.mrf.mxu1 }
  0xc9   : > { %v2654_v18 = vadd.f32 %v1170_v17, %v525_v3  ;;  %v1221_v19 = vpop.f32.mrf.mxu3 }
  0xcb   : > { %v1252_v20 = vpop.f32.mrf.mxu0 }
  0xce   : > { %v1180_v21 = vpop.f32.mrf.mxu2 }
  0xcf   : > { %v2656_v22 = vadd.f32 %v1180_v21, %v535_v13 }
  0xd0   : > { %v1279_v23 = vpop.f32.mrf.mxu1 }
  0xd1   : > { %v1223_v24 = vpop.f32.mrf.mxu3 }
  0xd3   : > { %v1255_v25 = vpop.f32.mrf.mxu0 }
  0xd6   : > { %v1192_v26 = vpop.f32.mrf.mxu2 }
  0xd7   : > { %v1193_v51 = vadd.f32 %v1192_v26, %v2642_v57 }
  0xd8   : > { %v1281_v27 = vpop.f32.mrf.mxu1 }
  0xd9   : > { %v1226_v28 = vpop.f32.mrf.mxu3  ;;  %v1222_v54 = vadd.f32 %v1221_v19, %v1193_v51 }
  0xdb   : > { %v2658_v29 = vpop.f32.mrf.mxu0  ;;  %v1251_v59 = vadd.f32 %v1250_v14, %v1222_v54 }
  0xdd   : > { %v1280_v63 = vadd.f32 %v1279_v23, %v1251_v59 }
  0xde   : > { %v1194_v30 = vpop.f32.mrf.mxu2 }
  0xdf   : > { %v1195_v58 = vadd.f32 %v1194_v30, %v1166_v0 }
  0xe0   : > { %v1284_v31 = vpop.f32.mrf.mxu1 }
  0xe1   : > { %v1228_v32 = vpop.f32.mrf.mxu3  ;;  %v1224_v61 = vadd.f32 %v1223_v24, %v1195_v58 }
  0xe3   : > { %v2660_v33 = vpop.f32.mrf.mxu0  ;;  %v1253_v57 = vadd.f32 %v1252_v20, %v1224_v61 }
  0xe5   : > { %v1282_v11 = vadd.f32 %v1281_v27, %v1253_v57 }
  0xe6   : > { %v1197_v34 = vpop.f32.mrf.mxu2 }
  0xe7   : > { %v1198_v5 = vadd.f32 %v1197_v34, %v1169_v12 }
  0xe8   : > { %v2662_v35 = vpop.f32.mrf.mxu1 }
  0xe9   : > { %v2664_v36 = vpop.f32.mrf.mxu3  ;;  %v1227_v0 = vadd.f32 %v1226_v28, %v1198_v5 }
  0xeb   : > { %v2666_v38 = vpop.f32.mrf.mxu0  ;;  %v1256_v21 = vadd.f32 %v1255_v25, %v1227_v0 }
  0xed   : > { %v1285_v27 = vadd.f32 %v1284_v31, %v1256_v21 }
  0xee   : > { %v1199_v37 = vpop.f32.mrf.mxu2 }
  0xef   : > { %v1200_v12 = vadd.f32 %v1199_v37, %v2654_v18 }
  0xf0   : > { %v2668_v39 = vpop.f32.mrf.mxu1 }
  0xf1   : > { %v2670_v40 = vpop.f32.mrf.mxu3  ;;  %v1229_v26 = vadd.f32 %v1228_v32, %v1200_v12 }
  0xf3   : > { %v2674_v43 = vpop.f32.mrf.mxu0 }
  0xf6   : > { %v1202_v41 = vpop.f32.mrf.mxu2 }
  0xf7   : > { %v1203_v18 = vadd.f32 %v1202_v41, %v2644_v62 }
  0xf8   : > { %v2672_v42 = vpop.f32.mrf.mxu1 }
  0xf9   : > { %v2676_v44 = vpop.f32.mrf.mxu3  ;;  %v1232_v58 = vadd.f32 %v2664_v36, %v1203_v18 }
  0xfb   : > { %v2684_v48 = vpop.f32.mrf.mxu0 }
  0xfe   : > { %v2678_v45 = vpop.f32.mrf.mxu2 }
  0xff   : > { %v1205_v62 = vadd.f32 %v2678_v45, %v2650_v8 }
 0x100   : > { %v2680_v46 = vpop.f32.mrf.mxu1 }
 0x101   : > { %v2682_v47 = vpop.f32.mrf.mxu3  ;;  %v1234_v36 = vadd.f32 %v2670_v40, %v1205_v62 }
 0x103   : > { %v1366_v53 = vpop.f32.mrf.mxu0 }
 0x106   : > { %v2686_v49 = vpop.f32.mrf.mxu2 }
 0x107   : > { %v1208_v8 = vadd.f32 %v2686_v49, %v2652_v16 }
 0x108   : > { %v2688_v50 = vpop.f32.mrf.mxu1 }
 0x109   : > { %v1337_v52 = vpop.f32.mrf.mxu3  ;;  %v1237_v40 = vadd.f32 %v2676_v44, %v1208_v8 }
 0x10b   : > { %v1368_v2 = vpop.f32.mrf.mxu0 }
 0x10e   : > { %v2691_v55 = vpop.f32.mrf.mxu2 }
 0x10f   : > { %v1210_v16 = vadd.f32 %v2691_v55, %v2656_v22 }
 0x110   : > { %v1395_v56 = vpop.f32.mrf.mxu1 }
 0x111   : > { %v1339_v60 = vpop.f32.mrf.mxu3  ;;  %v1239_v44 = vadd.f32 %v2682_v47, %v1210_v16 }
 0x113   : > { %v1371_v19 = vpop.f32.mrf.mxu0  ;;  %v1268_v55 = vadd.f32 %v2684_v48, %v1239_v44 }
 0x115   : > { %v1297_v47 = vadd.f32 %v2688_v50, %v1268_v55 }
 0x116   : > { %v1308_v1 = vpop.f32.mrf.mxu2 }
 0x117   : > { %v1309_v3 = vadd.f32 %v1308_v1, %v1280_v63 }
 0x118   : > { %v1397_v4 = vpop.f32.mrf.mxu1 }
 0x119   : > { %v1338_v6 = vadd.f32 %v1337_v52, %v1309_v3  ;;  %v1342_v14 = vpop.f32.mrf.mxu3 }
 0x11b   : > { %v1367_v7 = vadd.f32 %v1366_v53, %v1338_v6  ;;  %v1258_v53 = vadd.f32 %v2658_v29, %v1229_v26  ;;  %v1373_v54 = vpop.f32.mrf.mxu0  ;;  %v1261_v29 = vadd.f32 %v2660_v33, %v1232_v58  ;;  %v1263_v33 = vadd.f32 %v2666_v38, %v1234_v36 }
 0x11c   : > { %v1266_v38 = vadd.f32 %v2674_v43, %v1237_v40 }
 0x11d   : > { %v1396_v10 = vadd.f32 %v1395_v56, %v1367_v7  ;;  %v1287_v31 = vadd.f32 %v2662_v35, %v1258_v53  ;;  %v1290_v35 = vadd.f32 %v2668_v39, %v1261_v29  ;;  %v1292_v39 = vadd.f32 %v2672_v42, %v1263_v33 }
 0x11e   : > { %v1310_v13 = vpop.f32.mrf.mxu2  ;;  %v1295_v42 = vadd.f32 %v2680_v46, %v1266_v38 }
 0x11f   : > { %v1419_v15 = vadd.f32 %v2699_v9, %v1396_v10  ;;  %v1311_v17 = vadd.f32 %v1310_v13, %v1282_v11 }
 0x120   : > { %v1400_v23 = vpop.f32.mrf.mxu1 }
 0x121   : > { %1427 = vst [vmem:[%s2703_s26] sm:$0xff] %v1419_v15  ;;  %v1340_v20 = vadd.f32 %v1339_v60, %v1311_v17  ;;  %v1344_v52 = vpop.f32.mrf.mxu3 }
 0x123   : > { %v1369_v24 = vadd.f32 %v1368_v2, %v1340_v20  ;;  %v1376_v2 = vpop.f32.mrf.mxu0 }
 0x125   : > { %v1398_v28 = vadd.f32 %v1397_v4, %v1369_v24 }
 0x126   : > { %v1313_v30 = vpop.f32.mrf.mxu2 }
 0x127   : > { %v1420_v34 = vadd.f32 %v2699_v9, %v1398_v28  ;;  %v1314_v51 = vadd.f32 %v1313_v30, %v1285_v27 }
 0x128   : > { %v1402_v25 = vpop.f32.mrf.mxu1 }
 0x129   : > { %1428 = vst [vmem:[%s2703_s26 + $0x8] sm:$0xff] %v1420_v34  ;;  %v1343_v37 = vadd.f32 %v1342_v14, %v1314_v51  ;;  %v1347_v63 = vpop.f32.mrf.mxu3 }
 0x12b   : > { %v1372_v56 = vadd.f32 %v1371_v19, %v1343_v37  ;;  %v1378_v11 = vpop.f32.mrf.mxu0 }
 0x12d   : > { %v1401_v32 = vadd.f32 %v1400_v23, %v1372_v56 }
 0x12e   : > { %v1315_v59 = vpop.f32.mrf.mxu2 }
 0x12f   : > { %v1421_v60 = vadd.f32 %v2699_v9, %v1401_v32  ;;  %v1316_v61 = vadd.f32 %v1315_v59, %v1287_v31 }
 0x130   : > { %v1405_v4 = vpop.f32.mrf.mxu1 }
 0x131   : > { %1429 = vst [vmem:[%s2703_s26 + $0x10] sm:$0xff] %v1421_v60  ;;  %v1345_v41 = vadd.f32 %v1344_v52, %v1316_v61  ;;  %v1349_v0 = vpop.f32.mrf.mxu3 }
 0x133   : > { %v1374_v1 = vadd.f32 %v1373_v54, %v1345_v41  ;;  %v1381_v26 = vpop.f32.mrf.mxu0 }
 0x135   : > { %v1403_v3 = vadd.f32 %v1402_v25, %v1374_v1 }
 0x136   : > { %v1318_v5 = vpop.f32.mrf.mxu2 }
 0x137   : > { %v1422_v6 = vadd.f32 %v2699_v9, %v1403_v3  ;;  %v1319_v57 = vadd.f32 %v1318_v5, %v1290_v35 }
 0x138   : > { %v1407_v17 = vpop.f32.mrf.mxu1 }
 0x139   : > { %1430 = vst [vmem:[%s2703_s26 + $0x18] sm:$0xff] %v1422_v6  ;;  %v1348_v45 = vadd.f32 %v1347_v63, %v1319_v57  ;;  %v1352_v20 = vpop.f32.mrf.mxu3 }
 0x13b   : > { %v1377_v7 = vadd.f32 %v1376_v2, %v1348_v45  ;;  %v1383_v48 = vpop.f32.mrf.mxu0 }
 0x13d   : > { %v1406_v10 = vadd.f32 %v1405_v4, %v1377_v7 }
 0x13e   : > { %v1320_v13 = vpop.f32.mrf.mxu2 }
 0x13f   : > { %v1423_v14 = vadd.f32 %v2699_v9, %v1406_v10  ;;  %v1321_v15 = vadd.f32 %v1320_v13, %v1292_v39 }
 0x140   : > { %v1410_v43 = vpop.f32.mrf.mxu1 }
 0x141   : > { %1431 = vst [vmem:[%s2703_s26 + $0x20] sm:$0xff] %v1423_v14  ;;  %v1350_v49 = vadd.f32 %v1349_v0, %v1321_v15  ;;  %v1354_v51 = vpop.f32.mrf.mxu3 }
 0x143   : > { %v1379_v19 = vadd.f32 %v1378_v11, %v1350_v49 }
 0x145   : > { %v1408_v12 = vadd.f32 %v1407_v17, %v1379_v19 }
 0x146   : > { %v1323_v21 = vpop.f32.mrf.mxu2 }
 0x147   : > { %v1424_v23 = vadd.f32 %v2699_v9, %v1408_v12  ;;  %v1324_v24 = vadd.f32 %v1323_v21, %v1295_v42 }
 0x148   : > { %v1412_v50 = vpop.f32.mrf.mxu1 }
 0x149   : > { %1432 = vst [vmem:[%s2703_s26 + $0x28] sm:$0xff] %v1424_v23  ;;  %v1353_v22 = vadd.f32 %v1352_v20, %v1324_v24 }
 0x14b   : > { %v1382_v28 = vadd.f32 %v1381_v26, %v1353_v22 }
 0x14d   : > { %v1411_v27 = vadd.f32 %v1410_v43, %v1382_v28 }
 0x14e   : > { %v1325_v30 = vpop.f32.mrf.mxu2 }
 0x14f   : > { %v1425_v46 = vadd.f32 %v2699_v9, %v1411_v27  ;;  %v1326_v34 = vadd.f32 %v1325_v30, %v1297_v47 }
 0x151   : > { %1433 = vst [vmem:[%s2703_s26 + $0x30] sm:$0xff] %v1425_v46  ;;  %v1355_v52 = vadd.f32 %v1354_v51, %v1326_v34 }
 0x153   : > { %v1384_v18 = vadd.f32 %v1383_v48, %v1355_v52 }
 0x155   : > { %v1413_v37 = vadd.f32 %v1412_v50, %v1384_v18 }
 0x157   : > { %v1426_v53 = vadd.f32 %v2699_v9, %v1413_v37 }
 0x159   : > { %1434 = vst [vmem:[%s2703_s26 + $0x38] sm:$0xff] %v1426_v53 }
 0x15a   : > { %2206 = shalt.err (!%p2203_p3)
}
 0x15b   : > { %s2243_s17 = smov 128   ;;  %s2244_s25 = smov 8  }
 0x15c   : > { %2137 = dma.vmem_to_hbm [thread:$0]  (%p2313_p5), %s1449_s11, 1024, %s1451_s12, %s1436_s22, %s2243_s17, %s2243_s17, %s2244_s25  }
 0x15d PF: > { %p2143_p4 = scmp.ge.s32.totalorder %s2241_s21, 2  ;;  %s1465_s26 = sand.u32 1, %s2229_s18  }
 0x15e   : > { %s1466_s30 = scalar_lea.sflag [#allocation3], %s1465_s26 }
 0x15f   : > { %p2140_p7 = pnand %p2143_p4, %p2317_p6 }
 0x161   : > { %p2141_p8 = pneg %p2140_p7 }
 0x163   : > { %2224 = dma.done.wait (%p2141_p8), %s1466_s30, 1024  }
 0x164   : > { %2226 = vsyncadd (%p2141_p8), %s1466_s30, 4294966272  ;;  %p15_p9 = scmp.ge.s32.totalorder %s2300_s24, 4   ;;  %s2783_s18 = smov %s2233_s19 }
 0x165   : > { %s2784_s19 = smov %s2237_s20  ;;  %s2785_s20 = smov %s2311_s27 }
 0x166   : > { %s2786_s21 = smov %s2300_s24  ;;  %17 = sbr.rel (!%p15_p9) target bundleno = 3 (0x3), region = 78 }
 0x16b   :  { %1472 = vsyncpa [#allocation3], 1 }
 0x16c   :  { %1474 = vsyncpa [#allocation3 + $0x1], 1 }

</bundles_post_ra>
